<compile_context>
chip_gen: v7x
topology: tpu7x:2x2x1
jax: 0.10.0
libtpu: 0.0.40
codegen_flags: <defaults>
</compile_context>

<pallas_src>
import functools

import jax
import jax.numpy as jnp
from jax.experimental import pallas as pl
from jax.experimental.pallas import tpu as pltpu

# ---------------------------------------------------------------------------
# Small synthetic "vit_base"-shaped config (scaled down).
# ---------------------------------------------------------------------------
BATCH = 2
CHANNELS = 3
IMG = 32
PATCH = 16
HIDDEN = 32            # stands in for 768
NUM_HEADS = 4
HEAD_DIM = HIDDEN // NUM_HEADS
MLP_DIM = 4 * HIDDEN
NUM_LAYERS = 2
POST_DIM = 16          # stands in for 256
N_CLASSES = 3
LN_EPS = 1e-12         # HF ViT layer_norm_eps

N_PATCHES = (IMG // PATCH) ** 2       # 4
SEQ = 1 + N_PATCHES                   # 5 valid tokens (CLS + patches)
SEQ_PAD = 8                           # padded to a full sublane tile

# Whole-array-in-VMEM BlockSpec (single fused invocation, no grid).
_VMEM = functools.partial(pl.BlockSpec, memory_space=pltpu.MemorySpace.VMEM)


# ---------------------------------------------------------------------------
# In-kernel helpers
# ---------------------------------------------------------------------------
def _ln(x, g, b, eps):
    """Row LayerNorm in f32. g/b are (1, D), broadcast over rows."""
    mu = jnp.mean(x, axis=-1, keepdims=True)
    var = jnp.mean((x - mu) ** 2, axis=-1, keepdims=True)
    return (x - mu) * jax.lax.rsqrt(var + eps) * g + b


def _bf16(x):
    return x.astype(jnp.bfloat16)


# ---------------------------------------------------------------------------
# Kernel 1: fused patch embedding  (conv-as-matmul + bias + pos + CLS + pad)
# ---------------------------------------------------------------------------
def _embed_kernel(pat_ref, w_ref, b_ref, cls_ref, pos_ref, o_ref,
                  *, batch, n_patches, seq, seq_pad):
    # pat_ref: (B*Np, C*P*P) f32 ; w_ref: (C*P*P, D) bf16 ; b_ref: (1, D) f32
    # cls_ref: (1, D) f32       ; pos_ref: (S, D) f32    ; o_ref: (B*SP, D) f32
    emb = jnp.dot(_bf16(pat_ref[...]), w_ref[...],
                  preferred_element_type=jnp.float32) + b_ref[...]       # (B*Np, D)
    pos = pos_ref[...]
    cls_row = cls_ref[...] + pos[0:1, :]                                 # (1, D)
    d = emb.shape[-1]
    pad = jnp.zeros((seq_pad - seq, d), jnp.float32)

    rows = []
    for bi in range(batch):
        emb_b = emb[bi * n_patches:(bi + 1) * n_patches, :] + pos[1:, :]
        rows.append(jnp.concatenate([cls_row, emb_b, pad], axis=0))      # (SP, D)
    o_ref[...] = jnp.concatenate(rows, axis=0)                           # (B*SP, D)


def embed(patches, patch_w, patch_b, cls, pos):
    n_in = 5
    return pl.pallas_call(
        functools.partial(_embed_kernel, batch=BATCH, n_patches=N_PATCHES,
                          seq=SEQ, seq_pad=SEQ_PAD),
        out_shape=jax.ShapeDtypeStruct((BATCH * SEQ_PAD, HIDDEN), jnp.float32),
        in_specs=[_VMEM()] * n_in,
        out_specs=_VMEM(),
    )(patches, patch_w, patch_b, cls, pos)


# ---------------------------------------------------------------------------
# Kernel 2: fused encoder layer
#   LN1 -> QKV (one matmul) -> attention -> out proj -> +res -> LN2 -> MLP -> +res
# ---------------------------------------------------------------------------
def _encoder_layer_kernel(x_ref, ln1_g_ref, ln1_b_ref, wqkv_ref, bqkv_ref,
                          wo_ref, bo_ref, ln2_g_ref, ln2_b_ref,
                          w1_ref, b1_ref, w2_ref, b2_ref, o_ref,
                          *, batch, seq_pad, seq, n_heads, head_dim, eps):
    d = n_heads * head_dim
    x = x_ref[...]                                                        # (B*SP, D) f32

    # --- attention block -------------------------------------------------
    h1 = _ln(x, ln1_g_ref[...], ln1_b_ref[...], eps)
    qkv = jnp.dot(_bf16(h1), wqkv_ref[...],
                  preferred_element_type=jnp.float32) + bqkv_ref[...]     # (B*SP, 3D)

    scale = 1.0 / (head_dim ** 0.5)
    col = jax.lax.broadcasted_iota(jnp.int32, (seq_pad, seq_pad), 1)
    valid = col < seq                                  # mask padded key columns

    batch_outs = []
    for bi in range(batch):                            # static loop (B small)
        r0 = bi * seq_pad
        head_outs = []
        for hi in range(n_heads):                      # static loop over heads
            c0 = hi * head_dim
            qh = qkv[r0:r0 + seq_pad, c0:c0 + head_dim] * scale           # (SP, Dh)
            kh = qkv[r0:r0 + seq_pad, d + c0:d + c0 + head_dim]
            vh = qkv[r0:r0 + seq_pad, 2 * d + c0:2 * d + c0 + head_dim]
            s = jnp.dot(qh, kh.T, preferred_element_type=jnp.float32)     # (SP, SP)
            s = jnp.where(valid, s, -1e30)
            s = s - jnp.max(s, axis=-1, keepdims=True)
            p = jnp.exp(s)
            p = p * pl.reciprocal(jnp.sum(p, axis=-1, keepdims=True), approx=True)
            head_outs.append(jnp.dot(p, vh, preferred_element_type=jnp.float32))
        batch_outs.append(jnp.concatenate(head_outs, axis=-1))            # (SP, D)
    attn = jnp.concatenate(batch_outs, axis=0)                            # (B*SP, D)
    attn = jnp.dot(_bf16(attn), wo_ref[...],
                   preferred_element_type=jnp.float32) + bo_ref[...]
    x = x + attn                                                          # residual 1

    # --- MLP block --------------------------------------------------------
    h2 = _ln(x, ln2_g_ref[...], ln2_b_ref[...], eps)
    mid = jnp.dot(_bf16(h2), w1_ref[...],
                  preferred_element_type=jnp.float32) + b1_ref[...]
    mid = jax.nn.gelu(mid)                              # tanh-approx gelu (EUP)
    mlp = jnp.dot(_bf16(mid), w2_ref[...],
                  preferred_element_type=jnp.float32) + b2_ref[...]
    o_ref[...] = (x + mlp).astype(o_ref.dtype)                            # residual 2


def encoder_layer(x, lyr):
    args = (x, lyr["ln1_g"], lyr["ln1_b"], lyr["wqkv"], lyr["bqkv"],
            lyr["wo"], lyr["bo"], lyr["ln2_g"], lyr["ln2_b"],
            lyr["w1"], lyr["b1"], lyr["w2"], lyr["b2"])
    return pl.pallas_call(
        functools.partial(_encoder_layer_kernel, batch=BATCH, seq_pad=SEQ_PAD,
                          seq=SEQ, n_heads=NUM_HEADS, head_dim=HEAD_DIM, eps=LN_EPS),
        out_shape=jax.ShapeDtypeStruct((BATCH * SEQ_PAD, HIDDEN), jnp.float32),
        in_specs=[_VMEM()] * len(args),
        out_specs=_VMEM(),
    )(*args)


# ---------------------------------------------------------------------------
# Kernel 3: fused head  (final LN on CLS rows only -> Linear -> ReLU -> Linear)
# ---------------------------------------------------------------------------
def _head_kernel(x_ref, lnf_g_ref, lnf_b_ref, w1_ref, b1_ref, w2_ref, b2_ref,
                 o_ref, *, batch, seq_pad, eps):
    # Only the CLS rows feed the classifier: slice them before the LayerNorm.
    cls = jnp.concatenate(
        [x_ref[bi * seq_pad:bi * seq_pad + 1, :] for bi in range(batch)], axis=0)
    h = _ln(cls, lnf_g_ref[...], lnf_b_ref[...], eps)
    h = jnp.dot(_bf16(h), w1_ref[...],
                preferred_element_type=jnp.float32) + b1_ref[...]
    h = jnp.maximum(h, 0.0)                             # ReLU (dropout = identity)
    out = jnp.dot(_bf16(h), w2_ref[...],
                  preferred_element_type=jnp.float32) + b2_ref[...]
    o_ref[...] = out.astype(o_ref.dtype)


def classifier_head(x, params):
    args = (x, params["ln_f_g"], params["ln_f_b"],
            params["clf_w1"], params["clf_b1"], params["clf_w2"], params["clf_b2"])
    return pl.pallas_call(
        functools.partial(_head_kernel, batch=BATCH, seq_pad=SEQ_PAD, eps=LN_EPS),
        out_shape=jax.ShapeDtypeStruct((BATCH, N_CLASSES), jnp.float32),
        in_specs=[_VMEM()] * len(args),
        out_specs=_VMEM(),
    )(*args)


# ---------------------------------------------------------------------------
# Parameter init (deterministic, synthetic).  Matmul weights stored in bf16.
# ---------------------------------------------------------------------------
def init_params(key):
    ks = iter(jax.random.split(key, 64))
    n = lambda shape, s=0.02: s * jax.random.normal(next(ks), shape, jnp.float32)
    bf = lambda shape: n(shape).astype(jnp.bfloat16)

    params = {
        "patch_w": bf((CHANNELS * PATCH * PATCH, HIDDEN)),   # conv as patch-matmul
        "patch_b": jnp.zeros((1, HIDDEN), jnp.float32),
        "cls": n((1, HIDDEN)),
        "pos": n((SEQ, HIDDEN)),
        "ln_f_g": jnp.ones((1, HIDDEN), jnp.float32),
        "ln_f_b": jnp.zeros((1, HIDDEN), jnp.float32),
        "clf_w1": bf((HIDDEN, POST_DIM)),
        "clf_b1": jnp.zeros((1, POST_DIM), jnp.float32),
        "clf_w2": bf((POST_DIM, N_CLASSES)),
        "clf_b2": jnp.zeros((1, N_CLASSES), jnp.float32),
        "layers": [],
    }
    for _ in range(NUM_LAYERS):
        params["layers"].append({
            "ln1_g": jnp.ones((1, HIDDEN), jnp.float32),
            "ln1_b": jnp.zeros((1, HIDDEN), jnp.float32),
            "wqkv": bf((HIDDEN, 3 * HIDDEN)),                # fused Q|K|V weight
            "bqkv": jnp.zeros((1, 3 * HIDDEN), jnp.float32),
            "wo": bf((HIDDEN, HIDDEN)),
            "bo": jnp.zeros((1, HIDDEN), jnp.float32),
            "ln2_g": jnp.ones((1, HIDDEN), jnp.float32),
            "ln2_b": jnp.zeros((1, HIDDEN), jnp.float32),
            "w1": bf((HIDDEN, MLP_DIM)),
            "b1": jnp.zeros((1, MLP_DIM), jnp.float32),
            "w2": bf((MLP_DIM, HIDDEN)),
            "b2": jnp.zeros((1, HIDDEN), jnp.float32),
        })
    return params


# ---------------------------------------------------------------------------
# Forward pass (mirrors ViTModel(...).last_hidden_state[:, 0, :] -> Classifier)
# ---------------------------------------------------------------------------
def vit_clf_forward(params, pixel_values):
    B, C, H, W = pixel_values.shape
    P = PATCH
    nh, nw = H // P, W // P

    # Patchify (pure layout glue: reshape/transpose, no compute).
    x = pixel_values.reshape(B, C, nh, P, nw, P)
    x = x.transpose(0, 2, 4, 1, 3, 5).reshape(B * nh * nw, C * P * P)

    # Fused embedding kernel -> (B*SEQ_PAD, D) token stream.
    h = embed(x, params["patch_w"], params["patch_b"], params["cls"], params["pos"])

    # One fused Pallas kernel per encoder layer.
    for lyr in params["layers"]:
        h = encoder_layer(h, lyr)

    # Fused final-LN(CLS only) + classifier head.
    return classifier_head(h, params)


# ---------------------------------------------------------------------------
if __name__ == "__main__":
    key = jax.random.PRNGKey(0)
    k_params, k_input = jax.random.split(key)
    params = init_params(k_params)
    pixel_values = jax.random.normal(
        k_input, (BATCH, CHANNELS, IMG, IMG), jnp.float32)   # NCHW, like PyTorch

    fwd = jax.jit(vit_clf_forward)
    out = fwd(params, pixel_values)
    out = jax.block_until_ready(out)

    assert out.shape == (BATCH, N_CLASSES), out.shape
    assert bool(jnp.all(jnp.isfinite(out)))
    print("KERNEL_OK")
</pallas_src>

<mosaic_0001>
module attributes {stable_mosaic.version = 11 : i64} {
  func.func @_embed_kernel(%arg0: memref<8x768xf32, #tpu.memory_space<vmem>>, %arg1: memref<768x32xbf16, #tpu.memory_space<vmem>>, %arg2: memref<1x32xf32, #tpu.memory_space<vmem>>, %arg3: memref<1x32xf32, #tpu.memory_space<vmem>>, %arg4: memref<5x32xf32, #tpu.memory_space<vmem>>, %arg5: memref<16x32xf32, #tpu.memory_space<vmem>>) attributes {dimension_semantics = [], scalar_prefetch = 0 : i64, scratch_operands = 0 : i64, tpu.core_type = #tpu.core_type<tc>} {
    %c0 = arith.constant 0 : index
    %c0_0 = arith.constant 0 : index
    %0 = vector.load %arg0[%c0, %c0_0] : memref<8x768xf32, #tpu.memory_space<vmem>>, vector<8x768xf32>
    %1 = arith.truncf %0 : vector<8x768xf32> to vector<8x768xbf16>
    %c0_1 = arith.constant 0 : index
    %c0_2 = arith.constant 0 : index
    %2 = vector.load %arg1[%c0_1, %c0_2] : memref<768x32xbf16, #tpu.memory_space<vmem>>, vector<768x32xbf16>
    %cst = arith.constant dense<0.000000e+00> : vector<8x32xf32>
    %3 = tpu.matmul %1, %2, %cst {dimension_numbers = #tpu.dot_dimension_numbers<[1], [0], [0], [1], [0, 0, 1, 1], [], []>} : vector<8x768xbf16>, vector<768x32xbf16>, vector<8x32xf32> -> vector<8x32xf32>
    %c0_3 = arith.constant 0 : index
    %c0_4 = arith.constant 0 : index
    %4 = vector.load %arg2[%c0_3, %c0_4] : memref<1x32xf32, #tpu.memory_space<vmem>>, vector<1x32xf32>
    %5 = vector.broadcast %4 : vector<1x32xf32> to vector<8x32xf32>
    %6 = arith.addf %3, %5 : vector<8x32xf32>
    %c0_5 = arith.constant 0 : index
    %c0_6 = arith.constant 0 : index
    %7 = vector.load %arg4[%c0_5, %c0_6] : memref<5x32xf32, #tpu.memory_space<vmem>>, vector<5x32xf32>
    %c0_7 = arith.constant 0 : index
    %c0_8 = arith.constant 0 : index
    %8 = vector.load %arg3[%c0_7, %c0_8] : memref<1x32xf32, #tpu.memory_space<vmem>>, vector<1x32xf32>
    %9 = vector.extract_strided_slice %7 {offsets = [0, 0], sizes = [1, 32], strides = [1, 1]} : vector<5x32xf32> to vector<1x32xf32>
    %10 = arith.addf %8, %9 : vector<1x32xf32>
    %cst_9 = arith.constant 0.000000e+00 : f32
    %11 = vector.broadcast %cst_9 : f32 to vector<3x32xf32>
    %12 = vector.extract_strided_slice %6 {offsets = [0, 0], sizes = [4, 32], strides = [1, 1]} : vector<8x32xf32> to vector<4x32xf32>
    %13 = vector.extract_strided_slice %7 {offsets = [1, 0], sizes = [4, 32], strides = [1, 1]} : vector<5x32xf32> to vector<4x32xf32>
    %14 = arith.addf %12, %13 : vector<4x32xf32>
    %15 = tpu.concatenate %10, %14, %11 in 0 : vector<1x32xf32>, vector<4x32xf32>, vector<3x32xf32> -> vector<8x32xf32>
    %16 = vector.extract_strided_slice %6 {offsets = [4, 0], sizes = [4, 32], strides = [1, 1]} : vector<8x32xf32> to vector<4x32xf32>
    %17 = vector.extract_strided_slice %7 {offsets = [1, 0], sizes = [4, 32], strides = [1, 1]} : vector<5x32xf32> to vector<4x32xf32>
    %18 = arith.addf %16, %17 : vector<4x32xf32>
    %19 = tpu.concatenate %10, %18, %11 in 0 : vector<1x32xf32>, vector<4x32xf32>, vector<3x32xf32> -> vector<8x32xf32>
    %20 = tpu.concatenate %15, %19 in 0 : vector<8x32xf32>, vector<8x32xf32> -> vector<16x32xf32>
    %c0_10 = arith.constant 0 : index
    %c0_11 = arith.constant 0 : index
    %21 = vector.load %arg5[%c0_10, %c0_11] : memref<16x32xf32, #tpu.memory_space<vmem>>, vector<16x32xf32>
    tpu.vector_store %arg5[%c0_10, %c0_11], %20 {strides = array<i32>} : memref<16x32xf32, #tpu.memory_space<vmem>>, vector<16x32xf32>,
    return
  }
}

module attributes {stable_mosaic.version = 11 : i64} {
  func.func @_encoder_layer_kernel(%arg0: memref<16x32xf32, #tpu.memory_space<vmem>>, %arg1: memref<1x32xf32, #tpu.memory_space<vmem>>, %arg2: memref<1x32xf32, #tpu.memory_space<vmem>>, %arg3: memref<32x96xbf16, #tpu.memory_space<vmem>>, %arg4: memref<1x96xf32, #tpu.memory_space<vmem>>, %arg5: memref<32x32xbf16, #tpu.memory_space<vmem>>, %arg6: memref<1x32xf32, #tpu.memory_space<vmem>>, %arg7: memref<1x32xf32, #tpu.memory_space<vmem>>, %arg8: memref<1x32xf32, #tpu.memory_space<vmem>>, %arg9: memref<32x128xbf16, #tpu.memory_space<vmem>>, %arg10: memref<1x128xf32, #tpu.memory_space<vmem>>, %arg11: memref<128x32xbf16, #tpu.memory_space<vmem>>, %arg12: memref<1x32xf32, #tpu.memory_space<vmem>>, %arg13: memref<16x32xf32, #tpu.memory_space<vmem>>) attributes {dimension_semantics = [], scalar_prefetch = 0 : i64, scratch_operands = 0 : i64, tpu.core_type = #tpu.core_type<tc>} {
    %c0 = arith.constant 0 : index
    %c0_0 = arith.constant 0 : index
    %0 = vector.load %arg0[%c0, %c0_0] : memref<16x32xf32, #tpu.memory_space<vmem>>, vector<16x32xf32>
    %c0_1 = arith.constant 0 : index
    %c0_2 = arith.constant 0 : index
    %1 = vector.load %arg1[%c0_1, %c0_2] : memref<1x32xf32, #tpu.memory_space<vmem>>, vector<1x32xf32>
    %c0_3 = arith.constant 0 : index
    %c0_4 = arith.constant 0 : index
    %2 = vector.load %arg2[%c0_3, %c0_4] : memref<1x32xf32, #tpu.memory_space<vmem>>, vector<1x32xf32>
    %cst = arith.constant dense<0.000000e+00> : vector<16xf32>
    %3 = vector.multi_reduction <add>, %0, %cst [1] : vector<16x32xf32> to vector<16xf32>
    %4 = vector.shape_cast %3 : vector<16xf32> to vector<16x1xf32>
    %cst_5 = arith.constant 3.200000e+01 : f32
    %5 = vector.broadcast %cst_5 : f32 to vector<16x1xf32>
    %6 = arith.divf %4, %5 : vector<16x1xf32>
    %7 = vector.broadcast %6 : vector<16x1xf32> to vector<16x32xf32>
    %8 = arith.subf %0, %7 : vector<16x32xf32>
    %9 = arith.mulf %8, %8 : vector<16x32xf32>
    %cst_6 = arith.constant dense<0.000000e+00> : vector<16xf32>
    %10 = vector.multi_reduction <add>, %9, %cst_6 [1] : vector<16x32xf32> to vector<16xf32>
    %11 = vector.shape_cast %10 : vector<16xf32> to vector<16x1xf32>
    %cst_7 = arith.constant 3.200000e+01 : f32
    %12 = vector.broadcast %cst_7 : f32 to vector<16x1xf32>
    %13 = arith.divf %11, %12 : vector<16x1xf32>
    %14 = vector.broadcast %6 : vector<16x1xf32> to vector<16x32xf32>
    %15 = arith.subf %0, %14 : vector<16x32xf32>
    %cst_8 = arith.constant 9.99999996E-13 : f32
    %16 = vector.broadcast %cst_8 : f32 to vector<16x1xf32>
    %17 = arith.addf %13, %16 : vector<16x1xf32>
    %18 = math.rsqrt %17 : vector<16x1xf32>
    %19 = vector.broadcast %18 : vector<16x1xf32> to vector<16x32xf32>
    %20 = arith.mulf %15, %19 : vector<16x32xf32>
    %21 = vector.broadcast %1 : vector<1x32xf32> to vector<16x32xf32>
    %22 = arith.mulf %20, %21 : vector<16x32xf32>
    %23 = vector.broadcast %2 : vector<1x32xf32> to vector<16x32xf32>
    %24 = arith.addf %22, %23 : vector<16x32xf32>
    %25 = arith.truncf %24 : vector<16x32xf32> to vector<16x32xbf16>
    %c0_9 = arith.constant 0 : index
    %c0_10 = arith.constant 0 : index
    %26 = vector.load %arg3[%c0_9, %c0_10] : memref<32x96xbf16, #tpu.memory_space<vmem>>, vector<32x96xbf16>
    %cst_11 = arith.constant dense<0.000000e+00> : vector<16x96xf32>
    %27 = tpu.matmul %25, %26, %cst_11 {dimension_numbers = #tpu.dot_dimension_numbers<[1], [0], [0], [1], [0, 0, 1, 1], [], []>} : vector<16x32xbf16>, vector<32x96xbf16>, vector<16x96xf32> -> vector<16x96xf32>
    %c0_12 = arith.constant 0 : index
    %c0_13 = arith.constant 0 : index
    %28 = vector.load %arg4[%c0_12, %c0_13] : memref<1x96xf32, #tpu.memory_space<vmem>>, vector<1x96xf32>
    %29 = vector.broadcast %28 : vector<1x96xf32> to vector<16x96xf32>
    %30 = arith.addf %27, %29 : vector<16x96xf32>
    %31 = tpu.iota {dimensions = array<i32: 1>} : vector<8x8xi32>
    %c5_i32 = arith.constant 5 : i32
    %32 = vector.broadcast %c5_i32 : i32 to vector<8x8xi32>
    %33 = arith.cmpi slt, %31, %32 : vector<8x8xi32>
    %34 = vector.extract_strided_slice %30 {offsets = [0, 0], sizes = [8, 8], strides = [1, 1]} : vector<16x96xf32> to vector<8x8xf32>
    %cst_14 = arith.constant 0.353553385 : f32
    %35 = vector.broadcast %cst_14 : f32 to vector<8x8xf32>
    %36 = arith.mulf %34, %35 : vector<8x8xf32>
    %37 = vector.extract_strided_slice %30 {offsets = [0, 32], sizes = [8, 8], strides = [1, 1]} : vector<16x96xf32> to vector<8x8xf32>
    %38 = vector.extract_strided_slice %30 {offsets = [0, 64], sizes = [8, 8], strides = [1, 1]} : vector<16x96xf32> to vector<8x8xf32>
    %39 = tpu.transpose %37, [1, 0] : vector<8x8xf32> -> vector<8x8xf32>
    %cst_15 = arith.constant dense<0.000000e+00> : vector<8x8xf32>
    %40 = tpu.matmul %36, %39, %cst_15 {dimension_numbers = #tpu.dot_dimension_numbers<[1], [0], [0], [1], [0, 0, 1, 1], [], []>} : vector<8x8xf32>, vector<8x8xf32>, vector<8x8xf32> -> vector<8x8xf32>
    %cst_16 = arith.constant -1.000000e+30 : f32
    %41 = vector.broadcast %cst_16 : f32 to vector<8x8xf32>
    %42 = arith.select %33, %40, %41 : vector<8x8xi1>, vector<8x8xf32>
    %cst_17 = arith.constant dense<0xFF800000> : vector<8xf32>
    %43 = vector.multi_reduction <maximumf>, %42, %cst_17 [1] : vector<8x8xf32> to vector<8xf32>
    %44 = vector.shape_cast %43 : vector<8xf32> to vector<8x1xf32>
    %45 = vector.broadcast %44 : vector<8x1xf32> to vector<8x8xf32>
    %46 = arith.subf %42, %45 : vector<8x8xf32>
    %47 = math.exp %46 : vector<8x8xf32>
    %cst_18 = arith.constant dense<0.000000e+00> : vector<8xf32>
    %48 = vector.multi_reduction <add>, %47, %cst_18 [1] : vector<8x8xf32> to vector<8xf32>
    %49 = vector.shape_cast %48 : vector<8xf32> to vector<8x1xf32>
    %50 = tpu.reciprocal %49 {approx = true} : vector<8x1xf32> -> vector<8x1xf32>
    %51 = vector.broadcast %50 : vector<8x1xf32> to vector<8x8xf32>
    %52 = arith.mulf %47, %51 : vector<8x8xf32>
    %cst_19 = arith.constant dense<0.000000e+00> : vector<8x8xf32>
    %53 = tpu.matmul %52, %38, %cst_19 {dimension_numbers = #tpu.dot_dimension_numbers<[1], [0], [0], [1], [0, 0, 1, 1], [], []>} : vector<8x8xf32>, vector<8x8xf32>, vector<8x8xf32> -> vector<8x8xf32>
    %54 = vector.extract_strided_slice %30 {offsets = [0, 8], sizes = [8, 8], strides = [1, 1]} : vector<16x96xf32> to vector<8x8xf32>
    %cst_20 = arith.constant 0.353553385 : f32
    %55 = vector.broadcast %cst_20 : f32 to vector<8x8xf32>
    %56 = arith.mulf %54, %55 : vector<8x8xf32>
    %57 = vector.extract_strided_slice %30 {offsets = [0, 40], sizes = [8, 8], strides = [1, 1]} : vector<16x96xf32> to vector<8x8xf32>
    %58 = vector.extract_strided_slice %30 {offsets = [0, 72], sizes = [8, 8], strides = [1, 1]} : vector<16x96xf32> to vector<8x8xf32>
    %59 = tpu.transpose %57, [1, 0] : vector<8x8xf32> -> vector<8x8xf32>
    %cst_21 = arith.constant dense<0.000000e+00> : vector<8x8xf32>
    %60 = tpu.matmul %56, %59, %cst_21 {dimension_numbers = #tpu.dot_dimension_numbers<[1], [0], [0], [1], [0, 0, 1, 1], [], []>} : vector<8x8xf32>, vector<8x8xf32>, vector<8x8xf32> -> vector<8x8xf32>
    %cst_22 = arith.constant -1.000000e+30 : f32
    %61 = vector.broadcast %cst_22 : f32 to vector<8x8xf32>
    %62 = arith.select %33, %60, %61 : vector<8x8xi1>, vector<8x8xf32>
    %cst_23 = arith.constant dense<0xFF800000> : vector<8xf32>
    %63 = vector.multi_reduction <maximumf>, %62, %cst_23 [1] : vector<8x8xf32> to vector<8xf32>
    %64 = vector.shape_cast %63 : vector<8xf32> to vector<8x1xf32>
    %65 = vector.broadcast %64 : vector<8x1xf32> to vector<8x8xf32>
    %66 = arith.subf %62, %65 : vector<8x8xf32>
    %67 = math.exp %66 : vector<8x8xf32>
    %cst_24 = arith.constant dense<0.000000e+00> : vector<8xf32>
    %68 = vector.multi_reduction <add>, %67, %cst_24 [1] : vector<8x8xf32> to vector<8xf32>
    %69 = vector.shape_cast %68 : vector<8xf32> to vector<8x1xf32>
    %70 = tpu.reciprocal %69 {approx = true} : vector<8x1xf32> -> vector<8x1xf32>
    %71 = vector.broadcast %70 : vector<8x1xf32> to vector<8x8xf32>
    %72 = arith.mulf %67, %71 : vector<8x8xf32>
    %cst_25 = arith.constant dense<0.000000e+00> : vector<8x8xf32>
    %73 = tpu.matmul %72, %58, %cst_25 {dimension_numbers = #tpu.dot_dimension_numbers<[1], [0], [0], [1], [0, 0, 1, 1], [], []>} : vector<8x8xf32>, vector<8x8xf32>, vector<8x8xf32> -> vector<8x8xf32>
    %74 = vector.extract_strided_slice %30 {offsets = [0, 16], sizes = [8, 8], strides = [1, 1]} : vector<16x96xf32> to vector<8x8xf32>
    %cst_26 = arith.constant 0.353553385 : f32
    %75 = vector.broadcast %cst_26 : f32 to vector<8x8xf32>
    %76 = arith.mulf %74, %75 : vector<8x8xf32>
    %77 = vector.extract_strided_slice %30 {offsets = [0, 48], sizes = [8, 8], strides = [1, 1]} : vector<16x96xf32> to vector<8x8xf32>
    %78 = vector.extract_strided_slice %30 {offsets = [0, 80], sizes = [8, 8], strides = [1, 1]} : vector<16x96xf32> to vector<8x8xf32>
    %79 = tpu.transpose %77, [1, 0] : vector<8x8xf32> -> vector<8x8xf32>
    %cst_27 = arith.constant dense<0.000000e+00> : vector<8x8xf32>
    %80 = tpu.matmul %76, %79, %cst_27 {dimension_numbers = #tpu.dot_dimension_numbers<[1], [0], [0], [1], [0, 0, 1, 1], [], []>} : vector<8x8xf32>, vector<8x8xf32>, vector<8x8xf32> -> vector<8x8xf32>
    %cst_28 = arith.constant -1.000000e+30 : f32
    %81 = vector.broadcast %cst_28 : f32 to vector<8x8xf32>
    %82 = arith.select %33, %80, %81 : vector<8x8xi1>, vector<8x8xf32>
    %cst_29 = arith.constant dense<0xFF800000> : vector<8xf32>
    %83 = vector.multi_reduction <maximumf>, %82, %cst_29 [1] : vector<8x8xf32> to vector<8xf32>
    %84 = vector.shape_cast %83 : vector<8xf32> to vector<8x1xf32>
    %85 = vector.broadcast %84 : vector<8x1xf32> to vector<8x8xf32>
    %86 = arith.subf %82, %85 : vector<8x8xf32>
    %87 = math.exp %86 : vector<8x8xf32>
    %cst_30 = arith.constant dense<0.000000e+00> : vector<8xf32>
    %88 = vector.multi_reduction <add>, %87, %cst_30 [1] : vector<8x8xf32> to vector<8xf32>
    %89 = vector.shape_cast %88 : vector<8xf32> to vector<8x1xf32>
    %90 = tpu.reciprocal %89 {approx = true} : vector<8x1xf32> -> vector<8x1xf32>
    %91 = vector.broadcast %90 : vector<8x1xf32> to vector<8x8xf32>
    %92 = arith.mulf %87, %91 : vector<8x8xf32>
    %cst_31 = arith.constant dense<0.000000e+00> : vector<8x8xf32>
    %93 = tpu.matmul %92, %78, %cst_31 {dimension_numbers = #tpu.dot_dimension_numbers<[1], [0], [0], [1], [0, 0, 1, 1], [], []>} : vector<8x8xf32>, vector<8x8xf32>, vector<8x8xf32> -> vector<8x8xf32>
    %94 = vector.extract_strided_slice %30 {offsets = [0, 24], sizes = [8, 8], strides = [1, 1]} : vector<16x96xf32> to vector<8x8xf32>
    %cst_32 = arith.constant 0.353553385 : f32
    %95 = vector.broadcast %cst_32 : f32 to vector<8x8xf32>
    %96 = arith.mulf %94, %95 : vector<8x8xf32>
    %97 = vector.extract_strided_slice %30 {offsets = [0, 56], sizes = [8, 8], strides = [1, 1]} : vector<16x96xf32> to vector<8x8xf32>
    %98 = vector.extract_strided_slice %30 {offsets = [0, 88], sizes = [8, 8], strides = [1, 1]} : vector<16x96xf32> to vector<8x8xf32>
    %99 = tpu.transpose %97, [1, 0] : vector<8x8xf32> -> vector<8x8xf32>
    %cst_33 = arith.constant dense<0.000000e+00> : vector<8x8xf32>
    %100 = tpu.matmul %96, %99, %cst_33 {dimension_numbers = #tpu.dot_dimension_numbers<[1], [0], [0], [1], [0, 0, 1, 1], [], []>} : vector<8x8xf32>, vector<8x8xf32>, vector<8x8xf32> -> vector<8x8xf32>
    %cst_34 = arith.constant -1.000000e+30 : f32
    %101 = vector.broadcast %cst_34 : f32 to vector<8x8xf32>
    %102 = arith.select %33, %100, %101 : vector<8x8xi1>, vector<8x8xf32>
    %cst_35 = arith.constant dense<0xFF800000> : vector<8xf32>
    %103 = vector.multi_reduction <maximumf>, %102, %cst_35 [1] : vector<8x8xf32> to vector<8xf32>
    %104 = vector.shape_cast %103 : vector<8xf32> to vector<8x1xf32>
    %105 = vector.broadcast %104 : vector<8x1xf32> to vector<8x8xf32>
    %106 = arith.subf %102, %105 : vector<8x8xf32>
    %107 = math.exp %106 : vector<8x8xf32>
    %cst_36 = arith.constant dense<0.000000e+00> : vector<8xf32>
    %108 = vector.multi_reduction <add>, %107, %cst_36 [1] : vector<8x8xf32> to vector<8xf32>
    %109 = vector.shape_cast %108 : vector<8xf32> to vector<8x1xf32>
    %110 = tpu.reciprocal %109 {approx = true} : vector<8x1xf32> -> vector<8x1xf32>
    %111 = vector.broadcast %110 : vector<8x1xf32> to vector<8x8xf32>
    %112 = arith.mulf %107, %111 : vector<8x8xf32>
    %cst_37 = arith.constant dense<0.000000e+00> : vector<8x8xf32>
    %113 = tpu.matmul %112, %98, %cst_37 {dimension_numbers = #tpu.dot_dimension_numbers<[1], [0], [0], [1], [0, 0, 1, 1], [], []>} : vector<8x8xf32>, vector<8x8xf32>, vector<8x8xf32> -> vector<8x8xf32>
    %114 = tpu.concatenate %53, %73, %93, %113 in 1 : vector<8x8xf32>, vector<8x8xf32>, vector<8x8xf32>, vector<8x8xf32> -> vector<8x32xf32>
    %115 = vector.extract_strided_slice %30 {offsets = [8, 0], sizes = [8, 8], strides = [1, 1]} : vector<16x96xf32> to vector<8x8xf32>
    %cst_38 = arith.constant 0.353553385 : f32
    %116 = vector.broadcast %cst_38 : f32 to vector<8x8xf32>
    %117 = arith.mulf %115, %116 : vector<8x8xf32>
    %118 = vector.extract_strided_slice %30 {offsets = [8, 32], sizes = [8, 8], strides = [1, 1]} : vector<16x96xf32> to vector<8x8xf32>
    %119 = vector.extract_strided_slice %30 {offsets = [8, 64], sizes = [8, 8], strides = [1, 1]} : vector<16x96xf32> to vector<8x8xf32>
    %120 = tpu.transpose %118, [1, 0] : vector<8x8xf32> -> vector<8x8xf32>
    %cst_39 = arith.constant dense<0.000000e+00> : vector<8x8xf32>
    %121 = tpu.matmul %117, %120, %cst_39 {dimension_numbers = #tpu.dot_dimension_numbers<[1], [0], [0], [1], [0, 0, 1, 1], [], []>} : vector<8x8xf32>, vector<8x8xf32>, vector<8x8xf32> -> vector<8x8xf32>
    %cst_40 = arith.constant -1.000000e+30 : f32
    %122 = vector.broadcast %cst_40 : f32 to vector<8x8xf32>
    %123 = arith.select %33, %121, %122 : vector<8x8xi1>, vector<8x8xf32>
    %cst_41 = arith.constant dense<0xFF800000> : vector<8xf32>
    %124 = vector.multi_reduction <maximumf>, %123, %cst_41 [1] : vector<8x8xf32> to vector<8xf32>
    %125 = vector.shape_cast %124 : vector<8xf32> to vector<8x1xf32>
    %126 = vector.broadcast %125 : vector<8x1xf32> to vector<8x8xf32>
    %127 = arith.subf %123, %126 : vector<8x8xf32>
    %128 = math.exp %127 : vector<8x8xf32>
    %cst_42 = arith.constant dense<0.000000e+00> : vector<8xf32>
    %129 = vector.multi_reduction <add>, %128, %cst_42 [1] : vector<8x8xf32> to vector<8xf32>
    %130 = vector.shape_cast %129 : vector<8xf32> to vector<8x1xf32>
    %131 = tpu.reciprocal %130 {approx = true} : vector<8x1xf32> -> vector<8x1xf32>
    %132 = vector.broadcast %131 : vector<8x1xf32> to vector<8x8xf32>
    %133 = arith.mulf %128, %132 : vector<8x8xf32>
    %cst_43 = arith.constant dense<0.000000e+00> : vector<8x8xf32>
    %134 = tpu.matmul %133, %119, %cst_43 {dimension_numbers = #tpu.dot_dimension_numbers<[1], [0], [0], [1], [0, 0, 1, 1], [], []>} : vector<8x8xf32>, vector<8x8xf32>, vector<8x8xf32> -> vector<8x8xf32>
    %135 = vector.extract_strided_slice %30 {offsets = [8, 8], sizes = [8, 8], strides = [1, 1]} : vector<16x96xf32> to vector<8x8xf32>
    %cst_44 = arith.constant 0.353553385 : f32
    %136 = vector.broadcast %cst_44 : f32 to vector<8x8xf32>
    %137 = arith.mulf %135, %136 : vector<8x8xf32>
    %138 = vector.extract_strided_slice %30 {offsets = [8, 40], sizes = [8, 8], strides = [1, 1]} : vector<16x96xf32> to vector<8x8xf32>
    %139 = vector.extract_strided_slice %30 {offsets = [8, 72], sizes = [8, 8], strides = [1, 1]} : vector<16x96xf32> to vector<8x8xf32>
    %140 = tpu.transpose %138, [1, 0] : vector<8x8xf32> -> vector<8x8xf32>
    %cst_45 = arith.constant dense<0.000000e+00> : vector<8x8xf32>
    %141 = tpu.matmul %137, %140, %cst_45 {dimension_numbers = #tpu.dot_dimension_numbers<[1], [0], [0], [1], [0, 0, 1, 1], [], []>} : vector<8x8xf32>, vector<8x8xf32>, vector<8x8xf32> -> vector<8x8xf32>
    %cst_46 = arith.constant -1.000000e+30 : f32
    %142 = vector.broadcast %cst_46 : f32 to vector<8x8xf32>
    %143 = arith.select %33, %141, %142 : vector<8x8xi1>, vector<8x8xf32>
    %cst_47 = arith.constant dense<0xFF800000> : vector<8xf32>
    %144 = vector.multi_reduction <maximumf>, %143, %cst_47 [1] : vector<8x8xf32> to vector<8xf32>
    %145 = vector.shape_cast %144 : vector<8xf32> to vector<8x1xf32>
    %146 = vector.broadcast %145 : vector<8x1xf32> to vector<8x8xf32>
    %147 = arith.subf %143, %146 : vector<8x8xf32>
    %148 = math.exp %147 : vector<8x8xf32>
    %cst_48 = arith.constant dense<0.000000e+00> : vector<8xf32>
    %149 = vector.multi_reduction <add>, %148, %cst_48 [1] : vector<8x8xf32> to vector<8xf32>
    %150 = vector.shape_cast %149 : vector<8xf32> to vector<8x1xf32>
    %151 = tpu.reciprocal %150 {approx = true} : vector<8x1xf32> -> vector<8x1xf32>
    %152 = vector.broadcast %151 : vector<8x1xf32> to vector<8x8xf32>
    %153 = arith.mulf %148, %152 : vector<8x8xf32>
    %cst_49 = arith.constant dense<0.000000e+00> : vector<8x8xf32>
    %154 = tpu.matmul %153, %139, %cst_49 {dimension_numbers = #tpu.dot_dimension_numbers<[1], [0], [0], [1], [0, 0, 1, 1], [], []>} : vector<8x8xf32>, vector<8x8xf32>, vector<8x8xf32> -> vector<8x8xf32>
    %155 = vector.extract_strided_slice %30 {offsets = [8, 16], sizes = [8, 8], strides = [1, 1]} : vector<16x96xf32> to vector<8x8xf32>
    %cst_50 = arith.constant 0.353553385 : f32
    %156 = vector.broadcast %cst_50 : f32 to vector<8x8xf32>
    %157 = arith.mulf %155, %156 : vector<8x8xf32>
    %158 = vector.extract_strided_slice %30 {offsets = [8, 48], sizes = [8, 8], strides = [1, 1]} : vector<16x96xf32> to vector<8x8xf32>
    %159 = vector.extract_strided_slice %30 {offsets = [8, 80], sizes = [8, 8], strides = [1, 1]} : vector<16x96xf32> to vector<8x8xf32>
    %160 = tpu.transpose %158, [1, 0] : vector<8x8xf32> -> vector<8x8xf32>
    %cst_51 = arith.constant dense<0.000000e+00> : vector<8x8xf32>
    %161 = tpu.matmul %157, %160, %cst_51 {dimension_numbers = #tpu.dot_dimension_numbers<[1], [0], [0], [1], [0, 0, 1, 1], [], []>} : vector<8x8xf32>, vector<8x8xf32>, vector<8x8xf32> -> vector<8x8xf32>
    %cst_52 = arith.constant -1.000000e+30 : f32
    %162 = vector.broadcast %cst_52 : f32 to vector<8x8xf32>
    %163 = arith.select %33, %161, %162 : vector<8x8xi1>, vector<8x8xf32>
    %cst_53 = arith.constant dense<0xFF800000> : vector<8xf32>
    %164 = vector.multi_reduction <maximumf>, %163, %cst_53 [1] : vector<8x8xf32> to vector<8xf32>
    %165 = vector.shape_cast %164 : vector<8xf32> to vector<8x1xf32>
    %166 = vector.broadcast %165 : vector<8x1xf32> to vector<8x8xf32>
    %167 = arith.subf %163, %166 : vector<8x8xf32>
    %168 = math.exp %167 : vector<8x8xf32>
    %cst_54 = arith.constant dense<0.000000e+00> : vector<8xf32>
    %169 = vector.multi_reduction <add>, %168, %cst_54 [1] : vector<8x8xf32> to vector<8xf32>
    %170 = vector.shape_cast %169 : vector<8xf32> to vector<8x1xf32>
    %171 = tpu.reciprocal %170 {approx = true} : vector<8x1xf32> -> vector<8x1xf32>
    %172 = vector.broadcast %171 : vector<8x1xf32> to vector<8x8xf32>
    %173 = arith.mulf %168, %172 : vector<8x8xf32>
    %cst_55 = arith.constant dense<0.000000e+00> : vector<8x8xf32>
    %174 = tpu.matmul %173, %159, %cst_55 {dimension_numbers = #tpu.dot_dimension_numbers<[1], [0], [0], [1], [0, 0, 1, 1], [], []>} : vector<8x8xf32>, vector<8x8xf32>, vector<8x8xf32> -> vector<8x8xf32>
    %175 = vector.extract_strided_slice %30 {offsets = [8, 24], sizes = [8, 8], strides = [1, 1]} : vector<16x96xf32> to vector<8x8xf32>
    %cst_56 = arith.constant 0.353553385 : f32
    %176 = vector.broadcast %cst_56 : f32 to vector<8x8xf32>
    %177 = arith.mulf %175, %176 : vector<8x8xf32>
    %178 = vector.extract_strided_slice %30 {offsets = [8, 56], sizes = [8, 8], strides = [1, 1]} : vector<16x96xf32> to vector<8x8xf32>
    %179 = vector.extract_strided_slice %30 {offsets = [8, 88], sizes = [8, 8], strides = [1, 1]} : vector<16x96xf32> to vector<8x8xf32>
    %180 = tpu.transpose %178, [1, 0] : vector<8x8xf32> -> vector<8x8xf32>
    %cst_57 = arith.constant dense<0.000000e+00> : vector<8x8xf32>
    %181 = tpu.matmul %177, %180, %cst_57 {dimension_numbers = #tpu.dot_dimension_numbers<[1], [0], [0], [1], [0, 0, 1, 1], [], []>} : vector<8x8xf32>, vector<8x8xf32>, vector<8x8xf32> -> vector<8x8xf32>
    %cst_58 = arith.constant -1.000000e+30 : f32
    %182 = vector.broadcast %cst_58 : f32 to vector<8x8xf32>
    %183 = arith.select %33, %181, %182 : vector<8x8xi1>, vector<8x8xf32>
    %cst_59 = arith.constant dense<0xFF800000> : vector<8xf32>
    %184 = vector.multi_reduction <maximumf>, %183, %cst_59 [1] : vector<8x8xf32> to vector<8xf32>
    %185 = vector.shape_cast %184 : vector<8xf32> to vector<8x1xf32>
    %186 = vector.broadcast %185 : vector<8x1xf32> to vector<8x8xf32>
    %187 = arith.subf %183, %186 : vector<8x8xf32>
    %188 = math.exp %187 : vector<8x8xf32>
    %cst_60 = arith.constant dense<0.000000e+00> : vector<8xf32>
    %189 = vector.multi_reduction <add>, %188, %cst_60 [1] : vector<8x8xf32> to vector<8xf32>
    %190 = vector.shape_cast %189 : vector<8xf32> to vector<8x1xf32>
    %191 = tpu.reciprocal %190 {approx = true} : vector<8x1xf32> -> vector<8x1xf32>
    %192 = vector.broadcast %191 : vector<8x1xf32> to vector<8x8xf32>
    %193 = arith.mulf %188, %192 : vector<8x8xf32>
    %cst_61 = arith.constant dense<0.000000e+00> : vector<8x8xf32>
    %194 = tpu.matmul %193, %179, %cst_61 {dimension_numbers = #tpu.dot_dimension_numbers<[1], [0], [0], [1], [0, 0, 1, 1], [], []>} : vector<8x8xf32>, vector<8x8xf32>, vector<8x8xf32> -> vector<8x8xf32>
    %195 = tpu.concatenate %134, %154, %174, %194 in 1 : vector<8x8xf32>, vector<8x8xf32>, vector<8x8xf32>, vector<8x8xf32> -> vector<8x32xf32>
    %196 = tpu.concatenate %114, %195 in 0 : vector<8x32xf32>, vector<8x32xf32> -> vector<16x32xf32>
    %197 = arith.truncf %196 : vector<16x32xf32> to vector<16x32xbf16>
    %c0_62 = arith.constant 0 : index
    %c0_63 = arith.constant 0 : index
    %198 = vector.load %arg5[%c0_62, %c0_63] : memref<32x32xbf16, #tpu.memory_space<vmem>>, vector<32x32xbf16>
    %cst_64 = arith.constant dense<0.000000e+00> : vector<16x32xf32>
    %199 = tpu.matmul %197, %198, %cst_64 {dimension_numbers = #tpu.dot_dimension_numbers<[1], [0], [0], [1], [0, 0, 1, 1], [], []>} : vector<16x32xbf16>, vector<32x32xbf16>, vector<16x32xf32> -> vector<16x32xf32>
    %c0_65 = arith.constant 0 : index
    %c0_66 = arith.constant 0 : index
    %200 = vector.load %arg6[%c0_65, %c0_66] : memref<1x32xf32, #tpu.memory_space<vmem>>, vector<1x32xf32>
    %201 = vector.broadcast %200 : vector<1x32xf32> to vector<16x32xf32>
    %202 = arith.addf %199, %201 : vector<16x32xf32>
    %203 = arith.addf %0, %202 : vector<16x32xf32>
    %c0_67 = arith.constant 0 : index
    %c0_68 = arith.constant 0 : index
    %204 = vector.load %arg7[%c0_67, %c0_68] : memref<1x32xf32, #tpu.memory_space<vmem>>, vector<1x32xf32>
    %c0_69 = arith.constant 0 : index
    %c0_70 = arith.constant 0 : index
    %205 = vector.load %arg8[%c0_69, %c0_70] : memref<1x32xf32, #tpu.memory_space<vmem>>, vector<1x32xf32>
    %cst_71 = arith.constant dense<0.000000e+00> : vector<16xf32>
    %206 = vector.multi_reduction <add>, %203, %cst_71 [1] : vector<16x32xf32> to vector<16xf32>
    %207 = vector.shape_cast %206 : vector<16xf32> to vector<16x1xf32>
    %cst_72 = arith.constant 3.200000e+01 : f32
    %208 = vector.broadcast %cst_72 : f32 to vector<16x1xf32>
    %209 = arith.divf %207, %208 : vector<16x1xf32>
    %210 = vector.broadcast %209 : vector<16x1xf32> to vector<16x32xf32>
    %211 = arith.subf %203, %210 : vector<16x32xf32>
    %212 = arith.mulf %211, %211 : vector<16x32xf32>
    %cst_73 = arith.constant dense<0.000000e+00> : vector<16xf32>
    %213 = vector.multi_reduction <add>, %212, %cst_73 [1] : vector<16x32xf32> to vector<16xf32>
    %214 = vector.shape_cast %213 : vector<16xf32> to vector<16x1xf32>
    %cst_74 = arith.constant 3.200000e+01 : f32
    %215 = vector.broadcast %cst_74 : f32 to vector<16x1xf32>
    %216 = arith.divf %214, %215 : vector<16x1xf32>
    %217 = vector.broadcast %209 : vector<16x1xf32> to vector<16x32xf32>
    %218 = arith.subf %203, %217 : vector<16x32xf32>
    %cst_75 = arith.constant 9.99999996E-13 : f32
    %219 = vector.broadcast %cst_75 : f32 to vector<16x1xf32>
    %220 = arith.addf %216, %219 : vector<16x1xf32>
    %221 = math.rsqrt %220 : vector<16x1xf32>
    %222 = vector.broadcast %221 : vector<16x1xf32> to vector<16x32xf32>
    %223 = arith.mulf %218, %222 : vector<16x32xf32>
    %224 = vector.broadcast %204 : vector<1x32xf32> to vector<16x32xf32>
    %225 = arith.mulf %223, %224 : vector<16x32xf32>
    %226 = vector.broadcast %205 : vector<1x32xf32> to vector<16x32xf32>
    %227 = arith.addf %225, %226 : vector<16x32xf32>
    %228 = arith.truncf %227 : vector<16x32xf32> to vector<16x32xbf16>
    %c0_76 = arith.constant 0 : index
    %c0_77 = arith.constant 0 : index
    %229 = vector.load %arg9[%c0_76, %c0_77] : memref<32x128xbf16, #tpu.memory_space<vmem>>, vector<32x128xbf16>
    %cst_78 = arith.constant dense<0.000000e+00> : vector<16x128xf32>
    %230 = tpu.matmul %228, %229, %cst_78 {dimension_numbers = #tpu.dot_dimension_numbers<[1], [0], [0], [1], [0, 0, 1, 1], [], []>} : vector<16x32xbf16>, vector<32x128xbf16>, vector<16x128xf32> -> vector<16x128xf32>
    %c0_79 = arith.constant 0 : index
    %c0_80 = arith.constant 0 : index
    %231 = vector.load %arg10[%c0_79, %c0_80] : memref<1x128xf32, #tpu.memory_space<vmem>>, vector<1x128xf32>
    %232 = vector.broadcast %231 : vector<1x128xf32> to vector<16x128xf32>
    %233 = arith.addf %230, %232 : vector<16x128xf32>
    %234 = arith.mulf %233, %233 : vector<16x128xf32>
    %235 = arith.mulf %233, %234 : vector<16x128xf32>
    %cst_81 = arith.constant 4.471500e-02 : f32
    %236 = vector.broadcast %cst_81 : f32 to vector<16x128xf32>
    %237 = arith.mulf %236, %235 : vector<16x128xf32>
    %238 = arith.addf %233, %237 : vector<16x128xf32>
    %cst_82 = arith.constant 0.797884583 : f32
    %239 = vector.broadcast %cst_82 : f32 to vector<16x128xf32>
    %240 = arith.mulf %239, %238 : vector<16x128xf32>
    %241 = math.tanh %240 : vector<16x128xf32>
    %cst_83 = arith.constant 1.000000e+00 : f32
    %242 = vector.broadcast %cst_83 : f32 to vector<16x128xf32>
    %243 = arith.addf %242, %241 : vector<16x128xf32>
    %cst_84 = arith.constant 5.000000e-01 : f32
    %244 = vector.broadcast %cst_84 : f32 to vector<16x128xf32>
    %245 = arith.mulf %244, %243 : vector<16x128xf32>
    %246 = arith.mulf %233, %245 : vector<16x128xf32>
    %247 = arith.truncf %246 : vector<16x128xf32> to vector<16x128xbf16>
    %c0_85 = arith.constant 0 : index
    %c0_86 = arith.constant 0 : index
    %248 = vector.load %arg11[%c0_85, %c0_86] : memref<128x32xbf16, #tpu.memory_space<vmem>>, vector<128x32xbf16>
    %cst_87 = arith.constant dense<0.000000e+00> : vector<16x32xf32>
    %249 = tpu.matmul %247, %248, %cst_87 {dimension_numbers = #tpu.dot_dimension_numbers<[1], [0], [0], [1], [0, 0, 1, 1], [], []>} : vector<16x128xbf16>, vector<128x32xbf16>, vector<16x32xf32> -> vector<16x32xf32>
    %c0_88 = arith.constant 0 : index
    %c0_89 = arith.constant 0 : index
    %250 = vector.load %arg12[%c0_88, %c0_89] : memref<1x32xf32, #tpu.memory_space<vmem>>, vector<1x32xf32>
    %251 = vector.broadcast %250 : vector<1x32xf32> to vector<16x32xf32>
    %252 = arith.addf %249, %251 : vector<16x32xf32>
    %253 = arith.addf %203, %252 : vector<16x32xf32>
    %c0_90 = arith.constant 0 : index
    %c0_91 = arith.constant 0 : index
    %254 = vector.load %arg13[%c0_90, %c0_91] : memref<16x32xf32, #tpu.memory_space<vmem>>, vector<16x32xf32>
    tpu.vector_store %arg13[%c0_90, %c0_91], %253 {strides = array<i32>} : memref<16x32xf32, #tpu.memory_space<vmem>>, vector<16x32xf32>,
    return
  }
}

module attributes {stable_mosaic.version = 11 : i64} {
  func.func @_head_kernel(%arg0: memref<16x32xf32, #tpu.memory_space<vmem>>, %arg1: memref<1x32xf32, #tpu.memory_space<vmem>>, %arg2: memref<1x32xf32, #tpu.memory_space<vmem>>, %arg3: memref<32x16xbf16, #tpu.memory_space<vmem>>, %arg4: memref<1x16xf32, #tpu.memory_space<vmem>>, %arg5: memref<16x3xbf16, #tpu.memory_space<vmem>>, %arg6: memref<1x3xf32, #tpu.memory_space<vmem>>, %arg7: memref<2x3xf32, #tpu.memory_space<vmem>>) attributes {dimension_semantics = [], scalar_prefetch = 0 : i64, scratch_operands = 0 : i64, tpu.core_type = #tpu.core_type<tc>} {
    %c0 = arith.constant 0 : index
    %c0_0 = arith.constant 0 : index
    %0 = vector.load %arg0[%c0, %c0_0] : memref<16x32xf32, #tpu.memory_space<vmem>>, vector<1x32xf32>
    %c8 = arith.constant 8 : index
    %c0_1 = arith.constant 0 : index
    %1 = vector.load %arg0[%c8, %c0_1] : memref<16x32xf32, #tpu.memory_space<vmem>>, vector<1x32xf32>
    %2 = tpu.concatenate %0, %1 in 0 : vector<1x32xf32>, vector<1x32xf32> -> vector<2x32xf32>
    %c0_2 = arith.constant 0 : index
    %c0_3 = arith.constant 0 : index
    %3 = vector.load %arg1[%c0_2, %c0_3] : memref<1x32xf32, #tpu.memory_space<vmem>>, vector<1x32xf32>
    %c0_4 = arith.constant 0 : index
    %c0_5 = arith.constant 0 : index
    %4 = vector.load %arg2[%c0_4, %c0_5] : memref<1x32xf32, #tpu.memory_space<vmem>>, vector<1x32xf32>
    %cst = arith.constant dense<0.000000e+00> : vector<2xf32>
    %5 = vector.multi_reduction <add>, %2, %cst [1] : vector<2x32xf32> to vector<2xf32>
    %6 = vector.shape_cast %5 : vector<2xf32> to vector<2x1xf32>
    %cst_6 = arith.constant 3.200000e+01 : f32
    %7 = vector.broadcast %cst_6 : f32 to vector<2x1xf32>
    %8 = arith.divf %6, %7 : vector<2x1xf32>
    %9 = vector.broadcast %8 : vector<2x1xf32> to vector<2x32xf32>
    %10 = arith.subf %2, %9 : vector<2x32xf32>
    %11 = arith.mulf %10, %10 : vector<2x32xf32>
    %cst_7 = arith.constant dense<0.000000e+00> : vector<2xf32>
    %12 = vector.multi_reduction <add>, %11, %cst_7 [1] : vector<2x32xf32> to vector<2xf32>
    %13 = vector.shape_cast %12 : vector<2xf32> to vector<2x1xf32>
    %cst_8 = arith.constant 3.200000e+01 : f32
    %14 = vector.broadcast %cst_8 : f32 to vector<2x1xf32>
    %15 = arith.divf %13, %14 : vector<2x1xf32>
    %16 = vector.broadcast %8 : vector<2x1xf32> to vector<2x32xf32>
    %17 = arith.subf %2, %16 : vector<2x32xf32>
    %cst_9 = arith.constant 9.99999996E-13 : f32
    %18 = vector.broadcast %cst_9 : f32 to vector<2x1xf32>
    %19 = arith.addf %15, %18 : vector<2x1xf32>
    %20 = math.rsqrt %19 : vector<2x1xf32>
    %21 = vector.broadcast %20 : vector<2x1xf32> to vector<2x32xf32>
    %22 = arith.mulf %17, %21 : vector<2x32xf32>
    %23 = vector.broadcast %3 : vector<1x32xf32> to vector<2x32xf32>
    %24 = arith.mulf %22, %23 : vector<2x32xf32>
    %25 = vector.broadcast %4 : vector<1x32xf32> to vector<2x32xf32>
    %26 = arith.addf %24, %25 : vector<2x32xf32>
    %27 = arith.truncf %26 : vector<2x32xf32> to vector<2x32xbf16>
    %c0_10 = arith.constant 0 : index
    %c0_11 = arith.constant 0 : index
    %28 = vector.load %arg3[%c0_10, %c0_11] : memref<32x16xbf16, #tpu.memory_space<vmem>>, vector<32x16xbf16>
    %cst_12 = arith.constant dense<0.000000e+00> : vector<2x16xf32>
    %29 = tpu.matmul %27, %28, %cst_12 {dimension_numbers = #tpu.dot_dimension_numbers<[1], [0], [0], [1], [0, 0, 1, 1], [], []>} : vector<2x32xbf16>, vector<32x16xbf16>, vector<2x16xf32> -> vector<2x16xf32>
    %c0_13 = arith.constant 0 : index
    %c0_14 = arith.constant 0 : index
    %30 = vector.load %arg4[%c0_13, %c0_14] : memref<1x16xf32, #tpu.memory_space<vmem>>, vector<1x16xf32>
    %31 = vector.broadcast %30 : vector<1x16xf32> to vector<2x16xf32>
    %32 = arith.addf %29, %31 : vector<2x16xf32>
    %cst_15 = arith.constant 0.000000e+00 : f32
    %33 = vector.broadcast %cst_15 : f32 to vector<2x16xf32>
    %34 = arith.maximumf %32, %33 : vector<2x16xf32>
    %35 = arith.truncf %34 : vector<2x16xf32> to vector<2x16xbf16>
    %c0_16 = arith.constant 0 : index
    %c0_17 = arith.constant 0 : index
    %36 = vector.load %arg5[%c0_16, %c0_17] : memref<16x3xbf16, #tpu.memory_space<vmem>>, vector<16x3xbf16>
    %cst_18 = arith.constant dense<0.000000e+00> : vector<2x3xf32>
    %37 = tpu.matmul %35, %36, %cst_18 {dimension_numbers = #tpu.dot_dimension_numbers<[1], [0], [0], [1], [0, 0, 1, 1], [], []>} : vector<2x16xbf16>, vector<16x3xbf16>, vector<2x3xf32> -> vector<2x3xf32>
    %c0_19 = arith.constant 0 : index
    %c0_20 = arith.constant 0 : index
    %38 = vector.load %arg6[%c0_19, %c0_20] : memref<1x3xf32, #tpu.memory_space<vmem>>, vector<1x3xf32>
    %39 = vector.broadcast %38 : vector<1x3xf32> to vector<2x3xf32>
    %40 = arith.addf %37, %39 : vector<2x3xf32>
    %c0_21 = arith.constant 0 : index
    %c0_22 = arith.constant 0 : index
    %41 = vector.load %arg7[%c0_21, %c0_22] : memref<2x3xf32, #tpu.memory_space<vmem>>, vector<2x3xf32>
    tpu.vector_store %arg7[%c0_21, %c0_22], %40 {strides = array<i32>} : memref<2x3xf32, #tpu.memory_space<vmem>>, vector<2x3xf32>,
    return
  }
}

</mosaic_0001>

<bundles_post_ra>
// kernel: vit_clf_forward.7
= control target key start
LH: loop header
LB: loop body
LE: loop exit
PB: predicated region body
PF: predicated region fallthrough
CT: control target
= control target key end

     0   :  { %vm33_vm0 = vcmask 1040384   ;;  %vm37_vm1 = vcmask 254976   ;;  %s353_s0 = inlined_call_operand.vmem [shape: f32[16,32], index: 0, kind: input, shape index: {}]   ;;  %s354_s1 = inlined_call_operand.vmem [shape: f32[1,32], index: 1, kind: input, shape index: {}]   ;;  %s355_s2 = inlined_call_operand.vmem [shape: f32[1,32], index: 2, kind: input, shape index: {}]   ;;  %s356_s3 = inlined_call_operand.vmem [shape: bf16[32,16], index: 3, kind: input, shape index: {}]   ;;  %s357_s4 = inlined_call_operand.vmem [shape: f32[1,16], index: 4, kind: input, shape index: {}]   ;;  %s358_s5 = inlined_call_operand.vmem [shape: bf16[16,3], index: 5, kind: input, shape index: {}]   ;;  %s359_s6 = inlined_call_operand.vmem [shape: f32[1,3], index: 6, kind: input, shape index: {}]   ;;  %s360_s7 = inlined_call_operand.hbm [shape: f32[2,3], index: 7, kind: output, shape index: {}]  }
   0x1   :  { %v28_v0 = vld [vmem:[%s353_s0] sm:$0x1]  ;;  %v29_v1 = vld [vmem:[%s353_s0 + $0x8] sm:$0x1] }
   0x2   :  { %v31_v2 = vrot.slane %v29_v1, 7 }
   0x4   :  { %v34_v3 = vsel %vm33_vm0, %v28_v0, %v31_v2 }
   0x5   :  { %12 = vsyncpa [#allocation3], 0  ;;  %v38_v4 = vsel %vm37_vm1, %v34_v3, 0.0  ;;  %v242_v10 = vld [vmem:[%s356_s3] sm:$0xff]   ;;  %v271_v11 = vmov 0.0   ;;  %v243_v12 = vld [vmem:[%s356_s3 + $0x8] sm:$0xff]  }
   0x6   :  { %39 = vadd.xlane.f32.xlu0 %v38_v4  ;;  %225 = vmatprep.subr.bf16.mxu0 %v271_v11  ;;  %vm272_vm2 = vmmov 0   ;;  %v211_v17 = vld [vmem:[%s354_s1] ss:$0 sm:$0xff]  ;;  %vm90_vm3 = vcmask 261120   ;;  %vm151_vm4 = vcmask 130048   ;;  %s273_s15 = smov [#allocation2]  }
   0x7   :  { %233 = vmatprep.subr.bf16.mxu1 %v271_v11  ;;  %226 = vmatpush3.bf16.msra.mxu0 %v242_v10  ;;  %v212_v19 = vld [vmem:[%s355_s2] ss:$0 sm:$0xff]  ;;  %vm195_vm5 = vcmask 17408  }
   0x8   :  { %229 = vmatprep.mubr.msk.bf16.mxu0 %vm272_vm2, %v271_v11  ;;  %227 = vmatprep.subr.bf16.mxu0 %v271_v11  ;;  %v244_v23 = vld [vmem:[%s358_s5] sm:$0xff]   ;;  %s203_s5 = sshll.u32 %s273_s15, 4  ;;  %s204_s5 = int_to_ptr.vmem [resolvable:$true] %s203_s5 }
   0x9   :  { %235 = vmatprep.mubr.msk.bf16.mxu1 %vm272_vm2, %v271_v11  ;;  %234 = vmatpush3.bf16.msra.mxu1 %v244_v23  ;;  %v213_v24 = vld [vmem:[%s357_s4] ss:$0 sm:$0xff]  ;;  %s247_s4 = scalar_lea.vmem %s204_s5, 32  ;;  %p252_p1 = scmp.lt.s32.totalorder %s204_s5, %s204_s5 }
   0xa   :  { %v217_v32 = vld [vmem:[%s359_s6] ss:$0 sm:$0xff]  ;;  %p248_p0 = scmp.ne.s32.totalorder %s204_s5, %s247_s4  ;;  %p253_p2 = scmp.lt.s32.totalorder %s247_s4, %s247_s4 }
   0xb   :  { %228 = vmatpush3.bf16.msra.mxu0 %v243_v12 }
   0xc   :  { %p254_p3 = por %p253_p2, %p252_p1 }
   0xe   :  { %p255_p4 = pnand %p254_p3, %p248_p0 }
  0x93   :  { %v40_v5 = vpop.xlane.xlu0 %39 }
  0x94   :  { %v42_v6 = vmul.f32 0.03125, %v40_v5 }
  0x96   :  { %v43_v7 = vsub.f32 %v34_v3, %v42_v6 }
  0x98   :  { %v44_v8 = vmul.f32 %v43_v7, %v43_v7 }
  0x9a   :  { %v45_v9 = vsel %vm37_vm1, %v44_v8, 0.0 }
  0x9b   :  { %46 = vadd.xlane.f32.xlu0 %v45_v9 }
 0x128   :  { %v47_v13 = vpop.xlane.xlu0 %46 }
 0x129   :  { %v48_v14 = vmul.f32 0.03125, %v47_v13 }
 0x12b   :  { %v49_v15 = vadd.f32 1e-12, %v48_v14 }
 0x12d   :  { %245 = vrsqrt.f32 %v49_v15 }
 0x137   :  { %v246_v16 = vpop.eup %245 }
 0x138   :  { %v51_v18 = vmul.f32 %v246_v16, %v43_v7 }
 0x13a   :  { %v58_v20 = vmul.f32 %v211_v17, %v51_v18 }
 0x13c   :  { %v65_v21 = vadd.f32 %v212_v19, %v58_v20 }
 0x13e   :  { %v66_v22 = vpack.c.bf16 %v65_v21, %v65_v21 }
 0x140   :  { %230 = vmatmul.mubr.msk.bf16.vlgmr.msra.gmra.mrb[0].mxu0 %vm90_vm3, %v66_v22 }
 0x213   :  { %v128_v25 = vpop.f32.mrb[0].mxu0 }
 0x214   :  { %v129_v26 = vadd.f32 %v213_v24, %v128_v25  ;;  %v231_v27 = vpop.f32.mrb[1].mxu0 }
 0x215   :  { %v131_v28 = vpop.f32.mrb[2].mxu0 }
 0x216   :  { %v134_v29 = vmax.f32 %v129_v26, 0.0  ;;  %v232_v30 = vpop.f32.mrb[3].mxu0 }
 0x218   :  { %v135_v31 = vpack.c.bf16 %v134_v29, %v134_v29 }
 0x21a   :  { %236 = vmatmul.mubr.msk.bf16.vlgmr.msra.gmra.mrb[0].mxu1 %vm151_vm4, %v135_v31 }
 0x2ed   :  { %v189_v33 = vpop.f32.mrb[0].mxu1 }
 0x2ee   :  { %v190_v34 = vadd.f32 %v217_v32, %v189_v33  ;;  %v237_v35 = vpop.f32.mrb[1].mxu1 }
 0x2ef   :  { %v192_v36 = vpop.f32.mrb[2].mxu1 }
 0x2f0   :  { %v238_v37 = vpop.f32.mrb[3].mxu1  ;;  %196 = vst.msk [vmem:[#allocation2] sm:$0x3] %vm195_vm5, %v190_v34 }
 0x2f1   :  { %258 = shalt.err (!%p255_p4)
}
 0x2f2   :  { %s259_s6 = scalar_lea.hbm %s360_s7, 32 }
 0x2f3   :  { %p260_p5 = scmp.ne.s32.totalorder %s360_s7, %s259_s6  ;;  %p263_p6 = scmp.lt.u32.totalorder %s259_s6, %s360_s7 }
 0x2f5   :  { %p265_p7 = pnand %p263_p6, %p260_p5 }
 0x2f7   :  { %268 = shalt.err (!%p265_p7)
}
 0x2f8   :  { %206 = dma.vmem_to_hbm [thread:$0]  %s204_s5, 32, %s360_s7, [#allocation3]  }
 0x2f9   :  { %269 = dma.done.wait [#allocation3], 32  }
 0x2fa   :  { %270 = vsyncadd [#allocation3], 4294967264 }
 0x2fb   :  { %210 = vsyncpa [#allocation3], 1 }

// kernel: vit_clf_forward.4
= control target key start
LH: loop header
LB: loop body
LE: loop exit
PB: predicated region body
PF: predicated region fallthrough
CT: control target
= control target key end

     0   :  { %vm554_vm0 = vcmask 1040384   ;;  %vm556_vm1 = vcmask 1044480   ;;  %vm566_vm2 = vcmask 261120   ;;  %s943_s1 = inlined_call_operand.vmem [shape: bf16[768,32], index: 1, kind: input, shape index: {}]   ;;  %s944_s0 = inlined_call_operand.vmem [shape: f32[8,768], index: 0, kind: input, shape index: {}]   ;;  %s945_s2 = inlined_call_operand.vmem [shape: f32[1,32], index: 2, kind: input, shape index: {}]   ;;  %s946_s4 = inlined_call_operand.vmem [shape: f32[5,32], index: 4, kind: input, shape index: {}]   ;;  %s947_s3 = inlined_call_operand.vmem [shape: f32[1,32], index: 3, kind: input, shape index: {}]   ;;  %s948_s5 = inlined_call_operand.vmem [shape: f32[16,32], index: 5, kind: output, shape index: {}]  }
   0x1   :  { %v688_v0 = vld [vmem:[%s943_s1 + $0x40] sm:$0xff]   ;;  %v692_v4 = vld [vmem:[%s943_s1 + $0x48] sm:$0xff]   ;;  %v696_v8 = vld [vmem:[%s943_s1 + $0x50] sm:$0xff]  }
   0x2   :  { %v689_v1 = vld [vmem:[%s943_s1] sm:$0xff]   ;;  %622 = vmatprep.subr.bf16.mxu0 %v688_v0  ;;  %v693_v5 = vld [vmem:[%s943_s1 + $0x8] sm:$0xff]   ;;  %v697_v9 = vld [vmem:[%s943_s1 + $0x10] sm:$0xff]  }
   0x3   :  { %v690_v2 = vld [vmem:[%s943_s1 + $0xc0] sm:$0xff]   ;;  %623 = vmatpush3.bf16.msra.mxu0 %v689_v1  ;;  %v694_v6 = vld [vmem:[%s943_s1 + $0xc8] sm:$0xff]   ;;  %v698_v10 = vld [vmem:[%s943_s1 + $0xd0] sm:$0xff]  }
   0x4   :  { %v691_v3 = vld [vmem:[%s943_s1 + $0x80] sm:$0xff]   ;;  %644 = vmatprep.subr.bf16.mxu1 %v690_v2  ;;  %624 = vmatprep.subr.bf16.mxu0 %v692_v4  ;;  %v695_v7 = vld [vmem:[%s943_s1 + $0x88] sm:$0xff]   ;;  %v699_v11 = vld [vmem:[%s943_s1 + $0x90] sm:$0xff]  }
   0x5   :  { %645 = vmatpush3.bf16.msra.mxu1 %v691_v3  ;;  %v700_v12 = vld [vmem:[%s943_s1 + $0x58] sm:$0xff]   ;;  %v704_v16 = vld [vmem:[%s943_s1 + $0x60] sm:$0xff]   ;;  %v708_v20 = vld [vmem:[%s943_s1 + $0x68] sm:$0xff]  }
   0x6   :  { %646 = vmatprep.subr.bf16.mxu1 %v694_v6  ;;  %v701_v13 = vld [vmem:[%s943_s1 + $0x18] sm:$0xff]   ;;  %v705_v17 = vld [vmem:[%s943_s1 + $0x20] sm:$0xff]   ;;  %v709_v21 = vld [vmem:[%s943_s1 + $0x28] sm:$0xff]  }
   0x7   :  { %625 = vmatpush3.bf16.msra.mxu0 %v693_v5  ;;  %v702_v14 = vld [vmem:[%s943_s1 + $0xd8] sm:$0xff]   ;;  %v706_v18 = vld [vmem:[%s943_s1 + $0xe0] sm:$0xff]   ;;  %v710_v22 = vld [vmem:[%s943_s1 + $0xe8] sm:$0xff]  }
   0x8   :  { %626 = vmatprep.subr.bf16.mxu0 %v696_v8  ;;  %v703_v15 = vld [vmem:[%s943_s1 + $0x98] sm:$0xff]   ;;  %v707_v19 = vld [vmem:[%s943_s1 + $0xa0] sm:$0xff]   ;;  %v711_v23 = vld [vmem:[%s943_s1 + $0xa8] sm:$0xff]  }
   0x9   :  { %647 = vmatpush3.bf16.msra.mxu1 %v695_v7  ;;  %v712_v24 = vld [vmem:[%s943_s1 + $0x70] sm:$0xff]   ;;  %v716_v28 = vld [vmem:[%s943_s1 + $0x78] sm:$0xff]   ;;  %v22_v31 = vld [vmem:[%s944_s0 + $0x8] sm:$0xff] }
   0xa   :  { %648 = vmatprep.subr.bf16.mxu1 %v698_v10  ;;  %v713_v25 = vld [vmem:[%s943_s1 + $0x30] sm:$0xff]   ;;  %v717_v29 = vld [vmem:[%s943_s1 + $0x38] sm:$0xff]   ;;  %v28_v32 = vpack.c.bf16 %v22_v31, %v22_v31  ;;  %v21_v34 = vld [vmem:[%s944_s0] sm:$0xff] }
   0xb   :  { %627 = vmatpush3.bf16.msra.mxu0 %v697_v9  ;;  %v714_v26 = vld [vmem:[%s943_s1 + $0xf0] sm:$0xff]   ;;  %v718_v30 = vld [vmem:[%s943_s1 + $0xf8] sm:$0xff]   ;;  %v27_v35 = vpack.c.bf16 %v21_v34, %v21_v34  ;;  %v720_v36 = vld [vmem:[%s943_s1 + $0x140] sm:$0xff]  }
   0xc   :  { %628 = vmatprep.subr.bf16.mxu0 %v700_v12  ;;  %v715_v27 = vld [vmem:[%s943_s1 + $0xb0] sm:$0xff]   ;;  %v719_v33 = vld [vmem:[%s943_s1 + $0xb8] sm:$0xff]   ;;  %456 = vmatprep.mubr.bf16.mxu0 %v28_v32  ;;  %v721_v39 = vld [vmem:[%s943_s1 + $0x100] sm:$0xff]  }
   0xd   :  { %649 = vmatpush3.bf16.msra.mxu1 %v699_v11  ;;  %v24_v37 = vld [vmem:[%s944_s0 + $0x18] sm:$0xff]  ;;  %v23_v40 = vld [vmem:[%s944_s0 + $0x10] sm:$0xff]  ;;  %v722_v42 = vld [vmem:[%s943_s1 + $0x148] sm:$0xff]  }
   0xe   :  { %650 = vmatprep.subr.bf16.mxu1 %v702_v14  ;;  %v30_v38 = vpack.c.bf16 %v24_v37, %v24_v37  ;;  %v29_v41 = vpack.c.bf16 %v23_v40, %v23_v40  ;;  %v723_v43 = vld [vmem:[%s943_s1 + $0x108] sm:$0xff]   ;;  %v724_v44 = vld [vmem:[%s943_s1 + $0x150] sm:$0xff]   ;;  %v726_v46 = vld [vmem:[%s943_s1 + $0x158] sm:$0xff]  }
   0xf   :  { %629 = vmatpush3.bf16.msra.mxu0 %v701_v13  ;;  %v725_v45 = vld [vmem:[%s943_s1 + $0x110] sm:$0xff]   ;;  %v727_v47 = vld [vmem:[%s943_s1 + $0x118] sm:$0xff]   ;;  %v728_v48 = vld [vmem:[%s943_s1 + $0x160] sm:$0xff]  }
  0x10   :  { %630 = vmatprep.subr.bf16.mxu0 %v704_v16  ;;  %496 = vmatprep.mubr.bf16.mxu1 %v30_v38  ;;  %v729_v49 = vld [vmem:[%s943_s1 + $0x120] sm:$0xff]   ;;  %v730_v50 = vld [vmem:[%s943_s1 + $0x168] sm:$0xff]   ;;  %v732_v54 = vld [vmem:[%s943_s1 + $0x170] sm:$0xff]  }
  0x11   :  { %651 = vmatpush3.bf16.msra.mxu1 %v703_v15  ;;  %v26_v51 = vld [vmem:[%s944_s0 + $0x28] sm:$0xff]  ;;  %v733_v55 = vld [vmem:[%s943_s1 + $0x130] sm:$0xff]   ;;  %v734_v56 = vld [vmem:[%s943_s1 + $0x178] sm:$0xff]  }
  0x12   :  { %652 = vmatprep.subr.bf16.mxu1 %v706_v18  ;;  %v32_v52 = vpack.c.bf16 %v26_v51, %v26_v51  ;;  %v731_v53 = vld [vmem:[%s943_s1 + $0x128] sm:$0xff]   ;;  %v735_v57 = vld [vmem:[%s943_s1 + $0x138] sm:$0xff]   ;;  %v25_v58 = vld [vmem:[%s944_s0 + $0x20] sm:$0xff] }
  0x13   :  { %631 = vmatpush3.bf16.msra.mxu0 %v705_v17  ;;  %v31_v59 = vpack.c.bf16 %v25_v58, %v25_v58  ;;  %v573_v61 = vld [vmem:[%s945_s2] ss:$0 sm:$0xff] }
  0x14   :  { %632 = vmatprep.subr.bf16.mxu0 %v708_v20  ;;  %v544_v9 = vld [vmem:[%s946_s4] sm:$0x1f] }
  0x15   :  { %653 = vmatpush3.bf16.msra.mxu1 %v707_v19  ;;  %v548_v13 = vrot.slane %v544_v9, 1  ;;  %v558_v14 = vrot.slane %v544_v9, 5  ;;  %v545_v16 = vld [vmem:[%s947_s3] sm:$0x1] }
  0x16   :  { %654 = vmatprep.subr.bf16.mxu1 %v710_v22  ;;  %v546_v19 = vadd.f32 %v545_v16, %v544_v9 }
  0x17   :  { %633 = vmatpush3.bf16.msra.mxu0 %v709_v21 }
  0x18   :  { %634 = vmatprep.subr.bf16.mxu0 %v712_v24 }
  0x19   :  { %655 = vmatpush3.bf16.msra.mxu1 %v711_v23 }
  0x1a   :  { %656 = vmatprep.subr.bf16.mxu1 %v714_v26 }
  0x1b   :  { %635 = vmatpush3.bf16.msra.mxu0 %v713_v25 }
  0x1c   :  { %636 = vmatprep.subr.bf16.mxu0 %v716_v28 }
  0x1d   :  { %657 = vmatpush3.bf16.msra.mxu1 %v715_v27 }
  0x1e   :  { %658 = vmatprep.subr.bf16.mxu1 %v718_v30 }
  0x1f   :  { %637 = vmatpush3.bf16.msra.mxu0 %v717_v29 }
  0x20   :  { %666 = vmatprep.subr.bf16.mxu0 %v720_v36 }
  0x21   :  { %659 = vmatpush3.bf16.msra.mxu1 %v719_v33 }
  0x22   :  { %457 = vmatmul.mubr.bf16.vlgmr.msra.gmra.mrb[0].mxu0 %v27_v35 }
  0x23   :  { %667 = vmatpush3.bf16.msra.mxu0 %v721_v39  ;;  %536 = vmatprep.mubr.bf16.mxu0 %v32_v52 }
  0x24   :  { %497 = vmatmul.mubr.bf16.vlgmr.msra.gmra.mrb[0].mxu1 %v29_v41  ;;  %668 = vmatprep.subr.bf16.mxu0 %v722_v42 }
  0x27   :  { %669 = vmatpush3.bf16.msra.mxu0 %v723_v43 }
  0x28   :  { %670 = vmatprep.subr.bf16.mxu0 %v724_v44 }
  0x2b   :  { %671 = vmatpush3.bf16.msra.mxu0 %v725_v45 }
  0x2c   :  { %672 = vmatprep.subr.bf16.mxu0 %v726_v46 }
  0x2f   :  { %673 = vmatpush3.bf16.msra.mxu0 %v727_v47 }
  0x30   :  { %674 = vmatprep.subr.bf16.mxu0 %v728_v48 }
  0x33   :  { %675 = vmatpush3.bf16.msra.mxu0 %v729_v49 }
  0x34   :  { %676 = vmatprep.subr.bf16.mxu0 %v730_v50 }
  0x37   :  { %677 = vmatpush3.bf16.msra.mxu0 %v731_v53 }
  0x38   :  { %678 = vmatprep.subr.bf16.mxu0 %v732_v54 }
  0x3b   :  { %679 = vmatpush3.bf16.msra.mxu0 %v733_v55 }
  0x3c   :  { %680 = vmatprep.subr.bf16.mxu0 %v734_v56 }
  0x3f   :  { %681 = vmatpush3.bf16.msra.mxu0 %v735_v57 }
  0x42   :  { %537 = vmatmul.mubr.bf16.vlgmr.msra.gmra.mrb[4].mxu0 %v31_v59 }
  0xf5   :  { %v638_v60 = vpop.f32.mrb[0].mxu0 }
  0xf6   :  { %v639_v62 = vpop.f32.mrb[1].mxu0 }
  0xf7   :  { %v640_v63 = vadd.f32 %v639_v62, %v638_v60  ;;  %v641_v0 = vpop.f32.mrb[2].mxu0  ;;  %v660_v1 = vpop.f32.mrb[0].mxu1 }
  0xf8   :  { %v642_v2 = vpop.f32.mrb[3].mxu0  ;;  %v661_v4 = vpop.f32.mrb[1].mxu1 }
  0xf9   :  { %v459_v3 = vadd.f32 %v640_v63, %v573_v61  ;;  %v662_v5 = vadd.f32 %v661_v4, %v660_v1  ;;  %v663_v6 = vpop.f32.mrb[2].mxu1 }
  0xfa   :  { %v664_v7 = vpop.f32.mrb[3].mxu1 }
  0xfb   :  { %v499_v8 = vadd.f32 %v662_v5, %v459_v3 }
 0x115   :  { %v682_v10 = vpop.f32.mrb[4].mxu0 }
 0x116   :  { %v683_v11 = vpop.f32.mrb[5].mxu0 }
 0x117   :  { %v684_v12 = vadd.f32 %v683_v11, %v682_v10  ;;  %v685_v15 = vpop.f32.mrb[6].mxu0 }
 0x118   :  { %v686_v17 = vpop.f32.mrb[7].mxu0 }
 0x119   :  { %v539_v18 = vadd.f32 %v684_v12, %v499_v8 }
 0x11b   :  { %v550_v20 = vadd.f32 %v548_v13, %v539_v18  ;;  %v560_v21 = vadd.f32 %v558_v14, %v539_v18 }
 0x11d   :  { %v552_v22 = vrot.slane %v550_v20, 7  ;;  %v562_v23 = vrot.slane %v560_v21, 3 }
 0x11f   :  { %v555_v24 = vsel %vm554_vm0, %v546_v19, %v552_v22  ;;  %v564_v25 = vsel %vm554_vm0, %v546_v19, %v562_v23 }
 0x120   :  { %v557_v26 = vsel %vm556_vm1, %v555_v24, 0.0  ;;  %v565_v27 = vsel %vm556_vm1, %v564_v25, 0.0 }
 0x121   :  { %567 = vst.msk [vmem:[%s948_s5] sm:$0xff] %vm566_vm2, %v557_v26  ;;  %568 = vst.msk [vmem:[%s948_s5 + $0x8] sm:$0xff] %vm566_vm2, %v565_v27 }

// kernel: vit_clf_forward.5
= control target key start
LH: loop header
LB: loop body
LE: loop exit
PB: predicated region body
PF: predicated region fallthrough
CT: control target
= control target key end

     0   :  { %vm49_vm0 = vcmask 261120   ;;  %v2160_v15 = vmov 0.0   ;;  %vm2161_vm1 = vmmov 0   ;;  %s2164_s20 = smov 80   ;;  %s2165_s21 = smov 72   ;;  %vm168_vm2 = vcmask 64512   ;;  %s2535_s0 = inlined_call_operand.vmem [shape: f32[16,32], index: 0, kind: input, shape index: {}]   ;;  %s2536_s3 = inlined_call_operand.vmem [shape: bf16[32,96], index: 3, kind: input, shape index: {}]   ;;  %s2537_s1 = inlined_call_operand.vmem [shape: f32[1,32], index: 1, kind: input, shape index: {}]   ;;  %s2538_s2 = inlined_call_operand.vmem [shape: f32[1,32], index: 2, kind: input, shape index: {}]   ;;  %s2539_s4 = inlined_call_operand.vmem [shape: f32[1,96], index: 4, kind: input, shape index: {}]   ;;  %s2540_s5 = inlined_call_operand.vmem [shape: bf16[32,32], index: 5, kind: input, shape index: {}]   ;;  %s2541_s6 = inlined_call_operand.vmem [shape: f32[1,32], index: 6, kind: input, shape index: {}]   ;;  %s2542_s9 = inlined_call_operand.vmem [shape: bf16[32,128], index: 9, kind: input, shape index: {}]   ;;  %s2543_s7 = inlined_call_operand.vmem [shape: f32[1,32], index: 7, kind: input, shape index: {}]   ;;  %s2544_s8 = inlined_call_operand.vmem [shape: f32[1,32], index: 8, kind: input, shape index: {}]   ;;  %s2545_s11 = inlined_call_operand.vmem [shape: bf16[128,32], index: 11, kind: input, shape index: {}]   ;;  %s2546_s10 = inlined_call_operand.vmem [shape: f32[1,128], index: 10, kind: input, shape index: {}]   ;;  %s2547_s12 = inlined_call_operand.vmem [shape: f32[1,32], index: 12, kind: input, shape index: {}]   ;;  %s2548_s13 = inlined_call_operand.vmem [shape: f32[16,32], index: 13, kind: output, shape index: {}]  }
   0x1   :  { %v2249_v0 = vld [vmem:[%s2535_s0] sm:$0xff]  ;;  %v2254_v1 = vld [vmem:[%s2535_s0 + $0x8] sm:$0xff]  ;;  %1947 = vmatprep.subr.bf16.mxu0 %v2160_v15  ;;  %1960 = vmatprep.subr.mxu1 %v2160_v15  ;;  %s2167_s22 = smov 112   ;;  %s2168_s23 = smov 104   ;;  %v161_v44 = vlaneseq  ;;  %vm843_vm4 = vcmask 130048   ;;  %vm845_vm5 = vcmask 195584  }
   0x2   :  { %v50_v2 = vsel %vm49_vm0, %v2249_v0, 0.0  ;;  %v53_v3 = vsel %vm49_vm0, %v2254_v1, 0.0  ;;  %v2102_v14 = vld [vmem:[%s2536_s3] sm:$0xff]   ;;  %v2103_v16 = vld [vmem:[%s2536_s3 + $0x8] sm:$0xff]   ;;  %1951 = vmatprep.mubr.msk.bf16.mxu0 %vm2161_vm1, %v2160_v15  ;;  %1962 = vmatprep.mubr.msk.f32.mxu1 %vm2161_vm1, %v2160_v15  ;;  %s2169_s24 = smov 64   ;;  %s2170_s25 = smov 56  }
   0x3   :  { %51 = vadd.xlane.f32.xlu0 %v50_v2  ;;  %1948 = vmatpush3.bf16.msra.mxu0 %v2102_v14  ;;  %v1848_v25 = vld [vmem:[%s2537_s1] ss:$0 sm:$0xff]  ;;  %s2162_s1 = smov 96   ;;  %v2316_v45 = vand.u32 127, %v161_v44  ;;  %s2171_s26 = smov 40  }
   0x4   :  { %1949 = vmatprep.subr.bf16.mxu0 %v2160_v15  ;;  %v1849_v29 = vld [vmem:[%s2538_s2] ss:$0 sm:$0xff]  ;;  %s2163_s2 = smov 88   ;;  %s2172_s27 = smov 48  }
   0x5   :  { %v1850_v34 = vld [vmem:[%s2539_s4] ss:$0 sm:$0xff]  ;;  %s2166_s4 = smov 120   ;;  %vm163_vm3 = vcmp.lt.s32.totalorder %v2316_v45, 5  ;;  %s2173_s14 = smov 8  }
   0x6   :  { %s2174_s3 = smov 16   ;;  %s2175_s15 = smov 24  }
   0x7   :  { %54 = vadd.xlane.f32.xlu0 %v53_v3  ;;  %1950 = vmatpush3.bf16.msra.mxu0 %v2103_v16 }
   0x8   :  { %1955 = vmatprep.subr.mxu0 %v2160_v15 }
  0x90   :  { %v52_v4 = vpop.xlane.xlu0 %51 }
  0x91   :  { %v57_v5 = vmul.f32 0.03125, %v52_v4 }
  0x93   :  { %v59_v6 = vsub.f32 %v2249_v0, %v57_v5 }
  0x94   :  { %v55_v7 = vpop.xlane.xlu0 %54 }
  0x95   :  { %v58_v8 = vmul.f32 0.03125, %v55_v7  ;;  %v61_v9 = vmul.f32 %v59_v6, %v59_v6 }
  0x97   :  { %v60_v10 = vsub.f32 %v2254_v1, %v58_v8  ;;  %v63_v11 = vsel %vm49_vm0, %v61_v9, 0.0 }
  0x98   :  { %64 = vadd.xlane.f32.xlu1 %v63_v11 }
  0x99   :  { %v62_v12 = vmul.f32 %v60_v10, %v60_v10 }
  0x9b   :  { %v66_v13 = vsel %vm49_vm0, %v62_v12, 0.0 }
  0x9c   :  { %67 = vadd.xlane.f32.xlu1 %v66_v13 }
 0x125   :  { %v65_v17 = vpop.xlane.xlu1 %64 }
 0x126   :  { %v69_v18 = vmul.f32 0.03125, %v65_v17 }
 0x128   :  { %v71_v19 = vadd.f32 1e-12, %v69_v18 }
 0x129   :  { %v68_v20 = vpop.xlane.xlu1 %67 }
 0x12a   :  { %2116 = vrsqrt.f32 %v71_v19  ;;  %v70_v21 = vmul.f32 0.03125, %v68_v20 }
 0x12c   :  { %v72_v22 = vadd.f32 1e-12, %v70_v21 }
 0x12e   :  { %2118 = vrsqrt.f32 %v72_v22 }
 0x134   :  { %v2117_v23 = vpop.eup %2116 }
 0x135   :  { %v75_v24 = vmul.f32 %v2117_v23, %v59_v6 }
 0x137   :  { %v83_v28 = vmul.f32 %v1848_v25, %v75_v24 }
 0x138   :  { %v2119_v26 = vpop.eup %2118 }
 0x139   :  { %v76_v27 = vmul.f32 %v2119_v26, %v60_v10  ;;  %v91_v31 = vadd.f32 %v1849_v29, %v83_v28 }
 0x13b   :  { %v84_v30 = vmul.f32 %v1848_v25, %v76_v27 }
 0x13d   :  { %v92_v32 = vadd.f32 %v1849_v29, %v84_v30 }
 0x13f   :  { %v93_v33 = vpack.c.bf16 %v92_v32, %v91_v31 }
 0x141   :  { %1952 = vmatmul.mubr.msk.bf16.vlgmr.msra.gmra.mrb[0].mxu0 %vm49_vm0, %v93_v33 }
 0x142   :  { %1957 = vmatprep.mubr.msk.f32.mxu0 %vm2161_vm1, %v2160_v15 }
 0x214   :  { %v154_v35 = vpop.f32.mrb[0].mxu0 }
 0x215   :  { %v2290_v36 = vadd.f32 %v1850_v34, %v154_v35  ;;  %v1953_v37 = vpop.f32.mrb[1].mxu0 }
 0x216   :  { %v157_v38 = vpop.f32.mrb[2].mxu0 }
 0x217   :  { %166 = vrot.lane.b32.xlu0 %v2290_v36, %s2162_s1  ;;  %v1954_v39 = vpop.f32.mrb[3].mxu0  ;;  %v2299_v40 = vadd.f32 %v1850_v34, %v157_v38  ;;  %v164_v43 = vmul.f32 0.35355338, %v2290_v36 }
 0x219   :  { %v2303_v41 = vmul.f32 0.35355338, %v2299_v40 }
 0x21b   :  { %334 = vrot.lane.b32.xlu0 %v2290_v36, %s2163_s2 }
 0x21f   :  { %500 = vrot.lane.b32.xlu0 %v2290_v36, %s2164_s20 }
 0x223   :  { %666 = vrot.lane.b32.xlu0 %v2290_v36, %s2165_s21 }
 0x227   :  { %849 = vrot.lane.b32.xlu0 %v2299_v40, %s2162_s1 }
 0x22b   :  { %1014 = vrot.lane.b32.xlu0 %v2303_v41, %s2166_s4 }
 0x22f   :  { %1180 = vrot.lane.b32.xlu0 %v2303_v41, %s2167_s22 }
 0x233   :  { %1346 = vrot.lane.b32.xlu0 %v2303_v41, %s2168_s23 }
 0x289   :  { %v167_v42 = vpop.permute.xlu0 %166 }
 0x28a   :  { %1956 = vmatpush3.xpose.msk.msra.mxu0 %vm168_vm2, %v167_v42 }
 0x28b   :  { %1970 = vmatprep.subr.mxu0 %v2160_v15 }
 0x28d   :  { %1958 = vmatmul.mubr.msk.f32.vlgmr.msra.gmra.mrb[4].mxu0 %vm168_vm2, %v164_v43  ;;  %v335_v58 = vpop.permute.xlu0 %334 }
 0x28e   :  { %1972 = vmatprep.mubr.msk.f32.mxu0 %vm2161_vm1, %v2160_v15 }
 0x291   :  { %v501_v60 = vpop.permute.xlu0 %500 }
 0x295   :  { %v667_v63 = vpop.permute.xlu0 %666 }
 0x299   :  { %v850_v3 = vpop.permute.xlu0 %849 }
 0x29d   :  { %v1015_v5 = vpop.permute.xlu0 %1014 }
 0x2a1   :  { %v1181_v7 = vpop.permute.xlu0 %1180 }
 0x2a5   :  { %v1347_v9 = vpop.permute.xlu0 %1346 }
 0x360   :  { %v240_v46 = vpop.f32.mrb[4].mxu0 }
 0x361   :  { %v244_v47 = vsel %vm163_vm3, %v240_v46, -1e+30  ;;  %v1959_v48 = vpop.f32.mrb[5].mxu0 }
 0x362   :  { %v245_v49 = vsel %vm168_vm2, %v244_v47, -inf }
 0x363   :  { %246 = vmax.xlane.f32.xlu1 %v245_v49 }
 0x374   :  { %256 = vrot.lane.b32.xlu1 %v2290_v36, %s2169_s24 }
 0x378   :  { %332 = vrot.lane.b32.xlu1 %v164_v43, %s2166_s4 }
 0x3f0   :  { %v247_v50 = vpop.xlane.xlu1 %246 }
 0x3f1   :  { %v248_v51 = vsub.f32 %v244_v47, %v247_v50 }
 0x3f3   :  { %v249_v52 = vmul.f32 1.442695, %v248_v51 }
 0x3f4   :  { %v257_v53 = vpop.permute.xlu1 %256 }
 0x3f5   :  { %2120 = vpow2.f32 %v249_v52  ;;  %1961 = vmatpush3.msra.mxu1 %v257_v53 }
 0x3f6   :  { %1965 = vmatprep.subr.mxu1 %v2160_v15 }
 0x3f8   :  { %v333_v56 = vpop.permute.xlu1 %332 }
 0x3ff   :  { %v2121_v54 = vpop.eup %2120 }
 0x400   :  { %v251_v55 = vsel %vm168_vm2, %v2121_v54, 0.0 }
 0x401   :  { %252 = vadd.xlane.f32.xlu1 %v251_v55 }
 0x412   :  { %498 = vrot.lane.b32.xlu1 %v164_v43, %s2167_s22 }
 0x416   :  { %664 = vrot.lane.b32.xlu1 %v164_v43, %s2168_s23 }
 0x41a   :  { %1016 = vrot.lane.b32.xlu1 %v2299_v40, %s2163_s2 }
 0x41e   :  { %1182 = vrot.lane.b32.xlu1 %v2299_v40, %s2164_s20 }
 0x422   :  { %1348 = vrot.lane.b32.xlu1 %v2299_v40, %s2165_s21 }
 0x48e   :  { %v253_v57 = vpop.xlane.xlu1 %252 }
 0x48f   :  { %2122 = vrcp.f32 %v253_v57 }
 0x492   :  { %v499_v62 = vpop.permute.xlu1 %498 }
 0x496   :  { %v665_v2 = vpop.permute.xlu1 %664 }
 0x499   :  { %v2123_v59 = vpop.eup %2122 }
 0x49a   :  { %v255_v61 = vmul.f32 %v2123_v59, %v2121_v54  ;;  %v1017_v4 = vpop.permute.xlu1 %1016 }
 0x49c   :  { %1963 = vmatmul.mubr.msk.f32.vlgmr.msra.gmra.mrb[0].mxu1 %vm168_vm2, %v255_v61 }
 0x49d   :  { %1966 = vmatpush3.xpose.msk.msra.mxu1 %vm168_vm2, %v335_v58  ;;  %1967 = vmatprep.mubr.msk.f32.mxu1 %vm2161_vm1, %v2160_v15 }
 0x49e   :  { %1975 = vmatprep.subr.mxu1 %v2160_v15  ;;  %v1183_v6 = vpop.permute.xlu1 %1182 }
 0x4a0   :  { %1968 = vmatmul.mubr.msk.f32.vlgmr.msra.gmra.mrb[2].mxu1 %vm168_vm2, %v333_v56 }
 0x4a1   :  { %1976 = vmatpush3.xpose.msk.msra.mxu1 %vm168_vm2, %v501_v60  ;;  %1977 = vmatprep.mubr.msk.f32.mxu1 %vm2161_vm1, %v2160_v15 }
 0x4a2   :  { %1985 = vmatprep.subr.mxu1 %v2160_v15  ;;  %v1349_v8 = vpop.permute.xlu1 %1348 }
 0x4a4   :  { %1978 = vmatmul.mubr.msk.f32.vlgmr.msra.gmra.mrb[4].mxu1 %vm168_vm2, %v499_v62 }
 0x4a5   :  { %1986 = vmatpush3.xpose.msk.msra.mxu1 %vm168_vm2, %v667_v63  ;;  %1987 = vmatprep.mubr.msk.f32.mxu1 %vm2161_vm1, %v2160_v15 }
 0x4a6   :  { %1995 = vmatprep.subr.mxu1 %v2160_v15 }
 0x4a8   :  { %1988 = vmatmul.mubr.msk.f32.vlgmr.msra.gmra.mrb[6].mxu1 %vm168_vm2, %v665_v2 }
 0x4a9   :  { %1996 = vmatpush3.xpose.msk.msra.mxu1 %vm168_vm2, %v850_v3  ;;  %1997 = vmatprep.mubr.msk.f32.mxu1 %vm2161_vm1, %v2160_v15 }
 0x4aa   :  { %2005 = vmatprep.subr.mxu1 %v2160_v15 }
 0x4ac   :  { %1998 = vmatmul.mubr.msk.f32.vlgmr.msra.gmra.mrb[8].mxu1 %vm168_vm2, %v2303_v41 }
 0x4ad   :  { %2006 = vmatpush3.xpose.msk.msra.mxu1 %vm168_vm2, %v1017_v4  ;;  %2007 = vmatprep.mubr.msk.f32.mxu1 %vm2161_vm1, %v2160_v15 }
 0x4ae   :  { %2015 = vmatprep.subr.mxu1 %v2160_v15 }
 0x4b0   :  { %2008 = vmatmul.mubr.msk.f32.vlgmr.msra.gmra.mrb[10].mxu1 %vm168_vm2, %v1015_v5 }
 0x4b1   :  { %2016 = vmatpush3.xpose.msk.msra.mxu1 %vm168_vm2, %v1183_v6  ;;  %2017 = vmatprep.mubr.msk.f32.mxu1 %vm2161_vm1, %v2160_v15 }
 0x4b2   :  { %2025 = vmatprep.subr.mxu1 %v2160_v15 }
 0x4b4   :  { %2018 = vmatmul.mubr.msk.f32.vlgmr.msra.gmra.mrb[12].mxu1 %vm168_vm2, %v1181_v7 }
 0x4b5   :  { %2026 = vmatpush3.xpose.msk.msra.mxu1 %vm168_vm2, %v1349_v8  ;;  %2027 = vmatprep.mubr.msk.f32.mxu1 %vm2161_vm1, %v2160_v15 }
 0x4b6   :  { %2051 = vmatprep.subr.bf16.mxu1 %v2160_v15 }
 0x4b8   :  { %2028 = vmatmul.mubr.msk.f32.vlgmr.msra.gmra.mrb[14].mxu1 %vm168_vm2, %v1347_v9 }
 0x4b9   :  { %2067 = vmatprep.mubr.msk.bf16.mxu1 %vm2161_vm1, %v2160_v15 }
 0x56f   :  { %v2373_v10 = vpop.f32.mrb[0].mxu1 }
 0x570   :  { %v1964_v11 = vpop.f32.mrb[1].mxu1 }
 0x573   :  { %v406_v12 = vpop.f32.mrb[2].mxu1 }
 0x574   :  { %v410_v13 = vsel %vm163_vm3, %v406_v12, -1e+30  ;;  %v1969_v14 = vpop.f32.mrb[3].mxu1 }
 0x575   :  { %v411_v16 = vsel %vm168_vm2, %v410_v13, -inf }
 0x576   :  { %412 = vmax.xlane.f32.xlu1 %v411_v16 }
 0x577   :  { %v572_v17 = vpop.f32.mrb[4].mxu1 }
 0x578   :  { %v576_v18 = vsel %vm163_vm3, %v572_v17, -1e+30  ;;  %v1979_v19 = vpop.f32.mrb[5].mxu1 }
 0x579   :  { %v577_v20 = vsel %vm168_vm2, %v576_v18, -inf }
 0x57a   :  { %578 = vmax.xlane.f32.xlu0 %v577_v20 }
 0x57b   :  { %v738_v21 = vpop.f32.mrb[6].mxu1 }
 0x57c   :  { %v742_v22 = vsel %vm163_vm3, %v738_v21, -1e+30  ;;  %v1989_v23 = vpop.f32.mrb[7].mxu1 }
 0x57d   :  { %v743_v24 = vsel %vm168_vm2, %v742_v22, -inf }
 0x57e   :  { %744 = vmax.xlane.f32.xlu0 %v743_v24 }
 0x57f   :  { %v922_v25 = vpop.f32.mrb[8].mxu1 }
 0x580   :  { %v926_v26 = vsel %vm163_vm3, %v922_v25, -1e+30  ;;  %v1999_v27 = vpop.f32.mrb[9].mxu1 }
 0x581   :  { %v927_v28 = vsel %vm168_vm2, %v926_v26, -inf }
 0x582   :  { %928 = vmax.xlane.f32.xlu0 %v927_v28 }
 0x583   :  { %v1088_v29 = vpop.f32.mrb[10].mxu1 }
 0x584   :  { %v1092_v30 = vsel %vm163_vm3, %v1088_v29, -1e+30  ;;  %v2009_v31 = vpop.f32.mrb[11].mxu1 }
 0x585   :  { %v1093_v32 = vsel %vm168_vm2, %v1092_v30, -inf }
 0x586   :  { %1094 = vmax.xlane.f32.xlu1 %v1093_v32 }
 0x587   :  { %v1254_v33 = vpop.f32.mrb[12].mxu1 }
 0x588   :  { %v1258_v34 = vsel %vm163_vm3, %v1254_v33, -1e+30  ;;  %v2019_v35 = vpop.f32.mrb[13].mxu1 }
 0x589   :  { %v1259_v37 = vsel %vm168_vm2, %v1258_v34, -inf }
 0x58a   :  { %1260 = vmax.xlane.f32.xlu0 %v1259_v37 }
 0x58b   :  { %v1420_v38 = vpop.f32.mrb[14].mxu1 }
 0x58c   :  { %v2029_v39 = vpop.f32.mrb[15].mxu1  ;;  %v1424_v41 = vsel %vm163_vm3, %v1420_v38, -1e+30 }
 0x58d   :  { %v1425_v42 = vsel %vm168_vm2, %v1424_v41, -inf }
 0x597   :  { %422 = vrot.lane.b32.xlu1 %v2290_v36, %s2170_s25 }
 0x5bb   :  { %1426 = vmax.xlane.f32.xlu1 %v1425_v42 }
 0x5cc   :  { %754 = vrot.lane.b32.xlu1 %v2290_v36, %s2171_s26 }
 0x5d0   :  { %938 = vrot.lane.b32.xlu1 %v2299_v40, %s2169_s24 }
 0x603   :  { %v413_v43 = vpop.xlane.xlu1 %412 }
 0x604   :  { %v414_v44 = vsub.f32 %v410_v13, %v413_v43 }
 0x606   :  { %v415_v46 = vmul.f32 1.442695, %v414_v44 }
 0x607   :  { %v579_v47 = vpop.xlane.xlu0 %578 }
 0x608   :  { %2124 = vpow2.f32 %v415_v46  ;;  %v580_v48 = vsub.f32 %v576_v18, %v579_v47 }
 0x60a   :  { %v581_v49 = vmul.f32 1.442695, %v580_v48 }
 0x60b   :  { %v745_v55 = vpop.xlane.xlu0 %744 }
 0x60c   :  { %2126 = vpow2.f32 %v581_v49  ;;  %v746_v56 = vsub.f32 %v742_v22, %v745_v55  ;;  %v2105_v55 = vld [vmem:[%s2540_s5 + $0x8] sm:$0xff]  }
 0x60e   :  { %v747_v59 = vmul.f32 1.442695, %v746_v56 }
 0x60f   :  { %v929_v57 = vpop.xlane.xlu0 %928 }
 0x610   :  { %v930_v58 = vsub.f32 %v926_v26, %v929_v57  ;;  %2128 = vpow2.f32 %v747_v59 }
 0x612   :  { %v2125_v45 = vpop.eup %2124  ;;  %v931_v62 = vmul.f32 1.442695, %v930_v58 }
 0x613   :  { %v1095_v50 = vpop.xlane.xlu1 %1094  ;;  %v417_v51 = vsel %vm168_vm2, %v2125_v45, 0.0 }
 0x614   :  { %418 = vadd.xlane.f32.xlu0 %v417_v51  ;;  %v1096_v60 = vsub.f32 %v1092_v30, %v1095_v50  ;;  %2130 = vpow2.f32 %v931_v62 }
 0x616   :  { %v2127_v52 = vpop.eup %2126  ;;  %v1097_v63 = vmul.f32 1.442695, %v1096_v60 }
 0x617   :  { %v423_v53 = vpop.permute.xlu1 %422  ;;  %v583_v54 = vsel %vm168_vm2, %v2127_v52, 0.0  ;;  %v1261_v61 = vpop.xlane.xlu0 %1260 }
 0x618   :  { %584 = vadd.xlane.f32.xlu1 %v583_v54  ;;  %1971 = vmatpush3.msra.mxu0 %v423_v53  ;;  %v1262_v2 = vsub.f32 %v1258_v34, %v1261_v61  ;;  %2132 = vpow2.f32 %v1097_v63 }
 0x619   :  { %1980 = vmatprep.subr.mxu0 %v2160_v15 }
 0x61a   :  { %v1263_v3 = vmul.f32 1.442695, %v1262_v2  ;;  %v2129_v4 = vpop.eup %2128 }
 0x61c   :  { %2134 = vpow2.f32 %v1263_v3 }
 0x61e   :  { %v2131_v5 = vpop.eup %2130 }
 0x61f   :  { %v933_v11 = vsel %vm168_vm2, %v2131_v5, 0.0 }
 0x622   :  { %v2133_v7 = vpop.eup %2132 }
 0x623   :  { %v1099_v12 = vsel %vm168_vm2, %v2133_v7, 0.0 }
 0x626   :  { %v2135_v13 = vpop.eup %2134 }
 0x627   :  { %v1265_v14 = vsel %vm168_vm2, %v2135_v13, 0.0 }
 0x629   :  { %1104 = vrot.lane.b32.xlu1 %v2299_v40, %s2170_s25 }
 0x62a   :  { %588 = vrot.lane.b32.xlu0 %v2290_v36, %s2172_s27  ;;  %v749_v36 = vsel %vm168_vm2, %v2129_v4, 0.0 }
 0x648   :  { %v1427_v6 = vpop.xlane.xlu1 %1426 }
 0x649   :  { %v1428_v8 = vsub.f32 %v1424_v41, %v1427_v6  ;;  %750 = vadd.xlane.f32.xlu0 %v749_v36 }
 0x64b   :  { %v1429_v9 = vmul.f32 1.442695, %v1428_v8 }
 0x64c   :  { %v755_v18 = vpop.permute.xlu1 %754 }
 0x64d   :  { %2136 = vpow2.f32 %v1429_v9  ;;  %934 = vadd.xlane.f32.xlu1 %v933_v11  ;;  %1100 = vadd.xlane.f32.xlu0 %v1099_v12 }
 0x650   :  { %v939_v19 = vpop.permute.xlu1 %938 }
 0x651   :  { %1266 = vadd.xlane.f32.xlu1 %v1265_v14 }
 0x657   :  { %v2137_v16 = vpop.eup %2136 }
 0x658   :  { %v1431_v17 = vsel %vm168_vm2, %v2137_v16, 0.0 }
 0x659   :  { %1432 = vadd.xlane.f32.xlu0 %v1431_v17 }
 0x662   :  { %1436 = vrot.lane.b32.xlu1 %v2299_v40, %s2171_s26 }
 0x66f   :  { %1270 = vrot.lane.b32.xlu0 %v2299_v40, %s2172_s27 }
 0x6a1   :  { %v419_v20 = vpop.xlane.xlu0 %418 }
 0x6a2   :  { %2138 = vrcp.f32 %v419_v20  ;;  %v1878_v20 = vld [vmem:[%s2541_s6] ss:$0 sm:$0xff] }
 0x6a5   :  { %v585_v21 = vpop.xlane.xlu1 %584  ;;  %v589_v24 = vpop.permute.xlu0 %588 }
 0x6a6   :  { %2140 = vrcp.f32 %v585_v21 }
 0x6a9   :  { %v1105_v40 = vpop.permute.xlu1 %1104 }
 0x6ac   :  { %v2139_v22 = vpop.eup %2138 }
 0x6ad   :  { %v421_v23 = vmul.f32 %v2139_v22, %v2125_v45 }
 0x6af   :  { %1973 = vmatmul.mubr.msk.f32.vlgmr.msra.gmra.mrb[6].mxu0 %vm168_vm2, %v421_v23 }
 0x6b0   :  { %v2141_v25 = vpop.eup %2140  ;;  %1981 = vmatpush3.msra.mxu0 %v589_v24  ;;  %1982 = vmatprep.mubr.msk.f32.mxu0 %vm2161_vm1, %v2160_v15 }
 0x6b1   :  { %v587_v26 = vmul.f32 %v2141_v25, %v2127_v52  ;;  %1990 = vmatprep.subr.mxu0 %v2160_v15  ;;  %v2104_v52 = vld [vmem:[%s2540_s5] sm:$0xff]  }
 0x6b3   :  { %1983 = vmatmul.mubr.msk.f32.vlgmr.msra.gmra.mrb[8].mxu0 %vm168_vm2, %v587_v26 }
 0x6b4   :  { %1991 = vmatpush3.msra.mxu0 %v755_v18  ;;  %1992 = vmatprep.mubr.msk.f32.mxu0 %vm2161_vm1, %v2160_v15 }
 0x6b5   :  { %2000 = vmatprep.subr.mxu0 %v2160_v15 }
 0x6d6   :  { %v751_v27 = vpop.xlane.xlu0 %750 }
 0x6d7   :  { %2142 = vrcp.f32 %v751_v27 }
 0x6da   :  { %v935_v28 = vpop.xlane.xlu1 %934  ;;  %v1101_v29 = vpop.xlane.xlu0 %1100 }
 0x6db   :  { %2144 = vrcp.f32 %v935_v28 }
 0x6dc   :  { %2146 = vrcp.f32 %v1101_v29 }
 0x6de   :  { %v1267_v30 = vpop.xlane.xlu1 %1266 }
 0x6df   :  { %2148 = vrcp.f32 %v1267_v30 }
 0x6e1   :  { %v2143_v31 = vpop.eup %2142 }
 0x6e2   :  { %v753_v32 = vmul.f32 %v2143_v31, %v2129_v4  ;;  %v1437_v44 = vpop.permute.xlu1 %1436 }
 0x6e4   :  { %1993 = vmatmul.mubr.msk.f32.vlgmr.msra.gmra.mrb[10].mxu0 %vm168_vm2, %v753_v32 }
 0x6e5   :  { %2001 = vmatpush3.msra.mxu0 %v939_v19  ;;  %2002 = vmatprep.mubr.msk.f32.mxu0 %vm2161_vm1, %v2160_v15  ;;  %v2145_v33 = vpop.eup %2144 }
 0x6e6   :  { %v1433_v34 = vpop.xlane.xlu0 %1432  ;;  %2010 = vmatprep.subr.mxu0 %v2160_v15  ;;  %v937_v35 = vmul.f32 %v2145_v33, %v2131_v5  ;;  %v2147_v37 = vpop.eup %2146 }
 0x6e7   :  { %2150 = vrcp.f32 %v1433_v34  ;;  %v1103_v38 = vmul.f32 %v2147_v37, %v2133_v7 }
 0x6e8   :  { %2003 = vmatmul.mubr.msk.f32.vlgmr.msra.gmra.mrb[12].mxu0 %vm168_vm2, %v937_v35 }
 0x6e9   :  { %2011 = vmatpush3.msra.mxu0 %v1105_v40  ;;  %2012 = vmatprep.mubr.msk.f32.mxu0 %vm2161_vm1, %v2160_v15  ;;  %v2149_v41 = vpop.eup %2148 }
 0x6ea   :  { %v1271_v39 = vpop.permute.xlu0 %1270  ;;  %2020 = vmatprep.subr.mxu0 %v2160_v15  ;;  %v1269_v42 = vmul.f32 %v2149_v41, %v2135_v13 }
 0x6ec   :  { %2013 = vmatmul.mubr.msk.f32.vlgmr.msra.gmra.mrb[14].mxu0 %vm168_vm2, %v1103_v38  ;;  %v2106_v38 = vld [vmem:[%s2542_s9] sm:$0xff]  }
 0x6ed   :  { %2021 = vmatpush3.msra.mxu0 %v1271_v39  ;;  %2022 = vmatprep.mubr.msk.f32.mxu0 %vm2161_vm1, %v2160_v15  ;;  %v2107_v39 = vld [vmem:[%s2542_s9 + $0x8] sm:$0xff]  }
 0x6ee   :  { %2030 = vmatprep.subr.mxu0 %v2160_v15 }
 0x6f0   :  { %2023 = vmatmul.mubr.msk.f32.vlgmr.msra.gmra.mrb[16].mxu0 %vm168_vm2, %v1269_v42 }
 0x6f1   :  { %v2151_v43 = vpop.eup %2150  ;;  %2031 = vmatpush3.msra.mxu0 %v1437_v44  ;;  %2032 = vmatprep.mubr.msk.f32.mxu0 %vm2161_vm1, %v2160_v15 }
 0x6f2   :  { %v1435_v46 = vmul.f32 %v2151_v43, %v2137_v16  ;;  %2035 = vmatprep.subr.bf16.mxu0 %v2160_v15 }
 0x6f4   :  { %2033 = vmatmul.mubr.msk.f32.vlgmr.msra.gmra.mrb[18].mxu0 %vm168_vm2, %v1435_v46 }
 0x6f5   :  { %2039 = vmatprep.mubr.msk.bf16.mxu0 %vm2161_vm1, %v2160_v15  ;;  %2036 = vmatpush3.bf16.msra.mxu0 %v2104_v52 }
 0x6f6   :  { %2037 = vmatprep.subr.bf16.mxu0 %v2160_v15 }
 0x6f9   :  { %2038 = vmatpush3.bf16.msra.mxu0 %v2105_v55 }
 0x6fa   :  { %2043 = vmatprep.subr.bf16.mxu0 %v2160_v15 }
 0x782   :  { %v494_v47 = vpop.f32.mrb[6].mxu0 }
 0x783   :  { %v1974_v48 = vpop.f32.mrb[7].mxu0 }
 0x786   :  { %v660_v49 = vpop.f32.mrb[8].mxu0 }
 0x787   :  { %v1984_v45 = vpop.f32.mrb[9].mxu0 }
 0x788   :  { %v1882_v45 = vld [vmem:[%s2543_s7] ss:$0 sm:$0xff] }
 0x7b7   :  { %v826_v50 = vpop.f32.mrb[10].mxu0 }
 0x7b8   :  { %v1994_v51 = vpop.f32.mrb[11].mxu0 }
 0x7bb   :  { %v1010_v53 = vpop.f32.mrb[12].mxu0 }
 0x7bc   :  { %v2004_v54 = vpop.f32.mrb[13].mxu0 }
 0x7bf   :  { %v1176_v56 = vpop.f32.mrb[14].mxu0 }
 0x7c0   :  { %v2087_v57 = vpack.i.bf16 %v1176_v56, %v494_v47  ;;  %v2014_v58 = vpop.f32.mrb[15].mxu0 }
 0x7c1   :  { %v2108_v58 = vld [vmem:[%s2545_s11] sm:$0xff]  }
 0x7c2   :  { %2088 = vrot.lane.b32.xlu0 %v2087_v57, %s2173_s14  ;;  %2052 = vmatpush3.bf16.msra.mxu1 %v2108_v58 }
 0x7c3   :  { %v1342_v59 = vpop.f32.mrb[16].mxu0  ;;  %2053 = vmatprep.subr.bf16.mxu1 %v2160_v15 }
 0x7c4   :  { %v2092_v60 = vpack.i.bf16 %v1342_v59, %v660_v49  ;;  %v2024_v61 = vpop.f32.mrb[17].mxu0  ;;  %v2109_v59 = vld [vmem:[%s2545_s11 + $0x8] sm:$0xff]  }
 0x7c5   :  { %v2111_v61 = vld [vmem:[%s2545_s11 + $0x18] sm:$0xff]  }
 0x7c6   :  { %2093 = vrot.lane.b32.xlu1 %v2092_v60, %s2174_s3  ;;  %2054 = vmatpush3.bf16.msra.mxu1 %v2109_v59  ;;  %v2110_v60 = vld [vmem:[%s2545_s11 + $0x10] sm:$0xff]  }
 0x7c7   :  { %v1508_v62 = vpop.f32.mrb[18].mxu0  ;;  %2055 = vmatprep.subr.bf16.mxu1 %v2160_v15 }
 0x7c8   :  { %v2097_v63 = vpack.i.bf16 %v1508_v62, %v826_v50  ;;  %v2034_v2 = vpop.f32.mrb[19].mxu0  ;;  %v2112_v62 = vld [vmem:[%s2545_s11 + $0x20] sm:$0xff]  }
 0x7c9   :  { %v2114_v2 = vld [vmem:[%s2545_s11 + $0x30] sm:$0xff]  }
 0x7ca   :  { %2098 = vrot.lane.b32.xlu0 %v2097_v63, %s2175_s15  ;;  %2056 = vmatpush3.bf16.msra.mxu1 %v2110_v60  ;;  %v2113_v63 = vld [vmem:[%s2545_s11 + $0x28] sm:$0xff]  }
 0x7cb   :  { %2057 = vmatprep.subr.bf16.mxu1 %v2160_v15 }
 0x7ce   :  { %2058 = vmatpush3.bf16.msra.mxu1 %v2111_v61 }
 0x7cf   :  { %2059 = vmatprep.subr.bf16.mxu1 %v2160_v15 }
 0x7d2   :  { %2060 = vmatpush3.bf16.msra.mxu1 %v2112_v62 }
 0x7d3   :  { %2061 = vmatprep.subr.bf16.mxu1 %v2160_v15 }
 0x7d6   :  { %2062 = vmatpush3.bf16.msra.mxu1 %v2113_v63 }
 0x7d7   :  { %2063 = vmatprep.subr.bf16.mxu1 %v2160_v15 }
 0x7da   :  { %2064 = vmatpush3.bf16.msra.mxu1 %v2114_v2 }
 0x7db   :  { %2065 = vmatprep.subr.bf16.mxu1 %v2160_v15 }
 0x834   :  { %v2089_v3 = vpop.permute.xlu0 %2088 }
 0x835   :  { %v2091_v5 = vunpack.i.h.bf16 %v2089_v3  ;;  %v2090_v6 = vunpack.i.l.bf16 %v2089_v3  ;;  %v2115_v3 = vld [vmem:[%s2545_s11 + $0x38] sm:$0xff]  }
 0x836   :  { %2066 = vmatpush3.bf16.msra.mxu1 %v2115_v3 }
 0x837   :  { %v1524_v9 = vsel %vm168_vm2, %v1010_v53, %v2091_v5  ;;  %v842_v11 = vsel %vm168_vm2, %v2373_v10, %v2090_v6  ;;  %v1883_v53 = vld [vmem:[%s2544_s8] ss:$0 sm:$0xff] }
 0x838   :  { %v2094_v4 = vpop.permute.xlu1 %2093 }
 0x839   :  { %v2096_v36 = vunpack.i.h.bf16 %v2094_v4  ;;  %v2095_v7 = vunpack.i.l.bf16 %v2094_v4  ;;  %v1884_v4 = vld [vmem:[%s2546_s10] ss:$0 sm:$0xff] }
 0x83b   :  { %v1525_v14 = vsel %vm843_vm4, %v1524_v9, %v2096_v36  ;;  %v844_v16 = vsel %vm843_vm4, %v842_v11, %v2095_v7 }
 0x83c   :  { %v2099_v8 = vpop.permute.xlu0 %2098 }
 0x83d   :  { %v2101_v12 = vunpack.i.h.bf16 %v2099_v8  ;;  %v2100_v13 = vunpack.i.l.bf16 %v2099_v8 }
 0x83f   :  { %v1526_v17 = vsel %vm845_vm5, %v1525_v14, %v2101_v12  ;;  %v846_v18 = vsel %vm845_vm5, %v844_v16, %v2100_v13 }
 0x840   :  { %v1527_v19 = vpack.c.bf16 %v1526_v17, %v846_v18 }
 0x842   :  { %2040 = vmatmul.mubr.msk.bf16.vlgmr.msra.gmra.mrb[20].mxu0 %vm49_vm0, %v1527_v19 }
 0x843   :  { %2047 = vmatprep.mubr.msk.bf16.mxu0 %vm2161_vm1, %v2160_v15  ;;  %2044 = vmatpush3.bf16.msra.mxu0 %v2106_v38 }
 0x844   :  { %2045 = vmatprep.subr.bf16.mxu0 %v2160_v15 }
 0x847   :  { %2046 = vmatpush3.bf16.msra.mxu0 %v2107_v39 }
 0x915   :  { %v1588_v21 = vpop.f32.mrb[20].mxu0 }
 0x916   :  { %v1589_v22 = vadd.f32 %v1878_v20, %v1588_v21  ;;  %v2041_v23 = vpop.f32.mrb[21].mxu0 }
 0x917   :  { %v1591_v10 = vpop.f32.mrb[22].mxu0 }
 0x918   :  { %v2461_v24 = vadd.f32 %v1589_v22, %v2249_v0  ;;  %v1592_v25 = vadd.f32 %v1878_v20, %v1591_v10  ;;  %v2042_v26 = vpop.f32.mrb[23].mxu0 }
 0x91a   :  { %v2464_v40 = vadd.f32 %v1592_v25, %v2254_v1  ;;  %v1599_v27 = vsel %vm49_vm0, %v2461_v24, 0.0 }
 0x91b   :  { %1600 = vadd.xlane.f32.xlu1 %v1599_v27 }
 0x91c   :  { %v1602_v28 = vsel %vm49_vm0, %v2464_v40, 0.0 }
 0x91d   :  { %1603 = vadd.xlane.f32.xlu0 %v1602_v28 }
 0x9a8   :  { %v1601_v29 = vpop.xlane.xlu1 %1600 }
 0x9a9   :  { %v1605_v30 = vmul.f32 0.03125, %v1601_v29 }
 0x9aa   :  { %v1604_v31 = vpop.xlane.xlu0 %1603 }
 0x9ab   :  { %v1607_v32 = vsub.f32 %v2461_v24, %v1605_v30  ;;  %v1606_v0 = vmul.f32 0.03125, %v1604_v31  ;;  %v1888_v30 = vld [vmem:[%s2547_s12] ss:$0 sm:$0xff] }
 0x9ad   :  { %v1608_v33 = vsub.f32 %v2464_v40, %v1606_v0  ;;  %v1609_v34 = vmul.f32 %v1607_v32, %v1607_v32 }
 0x9af   :  { %v1611_v1 = vsel %vm49_vm0, %v1609_v34, 0.0  ;;  %v1610_v35 = vmul.f32 %v1608_v33, %v1608_v33 }
 0x9b0   :  { %1612 = vadd.xlane.f32.xlu0 %v1611_v1 }
 0x9b1   :  { %v1614_v37 = vsel %vm49_vm0, %v1610_v35, 0.0 }
 0x9b4   :  { %1615 = vadd.xlane.f32.xlu0 %v1614_v37 }
 0xa3d   :  { %v1613_v41 = vpop.xlane.xlu0 %1612 }
 0xa3e   :  { %v1617_v42 = vmul.f32 0.03125, %v1613_v41 }
 0xa40   :  { %v1619_v43 = vadd.f32 1e-12, %v1617_v42 }
 0xa41   :  { %v1616_v44 = vpop.xlane.xlu0 %1615 }
 0xa42   :  { %2152 = vrsqrt.f32 %v1619_v43  ;;  %v1618_v46 = vmul.f32 0.03125, %v1616_v44 }
 0xa44   :  { %v1620_v47 = vadd.f32 1e-12, %v1618_v46 }
 0xa46   :  { %2154 = vrsqrt.f32 %v1620_v47 }
 0xa4c   :  { %v2153_v48 = vpop.eup %2152 }
 0xa4d   :  { %v1623_v49 = vmul.f32 %v2153_v48, %v1607_v32 }
 0xa4f   :  { %v1631_v51 = vmul.f32 %v1882_v45, %v1623_v49 }
 0xa50   :  { %v2155_v50 = vpop.eup %2154 }
 0xa51   :  { %v1624_v52 = vmul.f32 %v2155_v50, %v1608_v33  ;;  %v1639_v55 = vadd.f32 %v1883_v53, %v1631_v51 }
 0xa53   :  { %v1632_v54 = vmul.f32 %v1882_v45, %v1624_v52 }
 0xa55   :  { %v1640_v56 = vadd.f32 %v1883_v53, %v1632_v54 }
 0xa57   :  { %v1641_v57 = vpack.c.bf16 %v1640_v56, %v1639_v55 }
 0xa59   :  { %2048 = vmatmul.mubr.msk.bf16.vlgmr.msra.gmra.mrb[24].mxu0 %vm49_vm0, %v1641_v57 }
 0xb2c   :  { %v1702_v5 = vpop.f32.mrb[24].mxu0 }
 0xb2d   :  { %v1703_v6 = vadd.f32 %v1884_v4, %v1702_v5  ;;  %v2049_v36 = vpop.f32.mrb[25].mxu0 }
 0xb2e   :  { %v1705_v7 = vpop.f32.mrb[26].mxu0 }
 0xb2f   :  { %v1709_v8 = vmul.f32 %v1703_v6, %v1703_v6  ;;  %v1706_v9 = vadd.f32 %v1884_v4, %v1705_v7  ;;  %v2050_v11 = vpop.f32.mrb[27].mxu0 }
 0xb31   :  { %v1711_v12 = vmul.f32 %v1709_v8, %v1703_v6  ;;  %v1710_v13 = vmul.f32 %v1706_v9, %v1706_v9 }
 0xb33   :  { %v1713_v14 = vmul.f32 0.044715, %v1711_v12  ;;  %v1712_v15 = vmul.f32 %v1710_v13, %v1706_v9 }
 0xb35   :  { %v1715_v16 = vadd.f32 %v1713_v14, %v1703_v6  ;;  %v1714_v17 = vmul.f32 0.044715, %v1712_v15 }
 0xb37   :  { %v1717_v18 = vmul.f32 0.7978846, %v1715_v16  ;;  %v1716_v19 = vadd.f32 %v1714_v17, %v1706_v9 }
 0xb39   :  { %2156 = vtanh.f32 %v1717_v18  ;;  %v1718_v20 = vmul.f32 0.7978846, %v1716_v19 }
 0xb3b   :  { %2158 = vtanh.f32 %v1718_v20 }
 0xb43   :  { %v2157_v21 = vpop.eup %2156 }
 0xb44   :  { %v1721_v22 = vadd.f32 1.0, %v2157_v21 }
 0xb45   :  { %v2159_v23 = vpop.eup %2158 }
 0xb46   :  { %v1723_v10 = vmul.f32 0.5, %v1721_v22  ;;  %v1722_v25 = vadd.f32 1.0, %v2159_v23 }
 0xb48   :  { %v1724_v26 = vmul.f32 0.5, %v1722_v25  ;;  %v1725_v27 = vmul.f32 %v1723_v10, %v1703_v6 }
 0xb4a   :  { %v1726_v28 = vmul.f32 %v1724_v26, %v1706_v9 }
 0xb4c   :  { %v1727_v29 = vpack.c.bf16 %v1726_v28, %v1725_v27 }
 0xb4e   :  { %2068 = vmatmul.mubr.bf16.vlgmr.msra.gmra.mrb[16].mxu1 %v1727_v29 }
 0xc21   :  { %v1833_v31 = vpop.f32.mrb[16].mxu1 }
 0xc22   :  { %v1834_v32 = vadd.f32 %v1888_v30, %v1833_v31  ;;  %v2069_v0 = vpop.f32.mrb[17].mxu1 }
 0xc23   :  { %v1836_v33 = vpop.f32.mrb[18].mxu1 }
 0xc24   :  { %v1840_v34 = vadd.f32 %v1834_v32, %v2461_v24  ;;  %v1837_v1 = vadd.f32 %v1888_v30, %v1836_v33  ;;  %v2070_v35 = vpop.f32.mrb[19].mxu1 }
 0xc26   :  { %1842 = vst.msk [vmem:[%s2548_s13] sm:$0xff] %vm49_vm0, %v1840_v34  ;;  %v1841_v37 = vadd.f32 %v1837_v1, %v2464_v40 }
 0xc28   :  { %1843 = vst.msk [vmem:[%s2548_s13 + $0x8] sm:$0xff] %vm49_vm0, %v1841_v37 }

</bundles_post_ra>
